<compile_context>
chip_gen: v5e
topology: v5e:2x2
jax: 0.10.0
libtpu: 0.0.40
codegen_flags: <defaults>
</compile_context>

<pallas_src>
import functools

import jax
import jax.numpy as jnp
from jax.experimental import pallas as pl
from jax.experimental.pallas import tpu as pltpu


def _round_up(x, m):
    return (x + m - 1) // m * m


def _cat_embedding_kernel(g_ref, w_ref, o_ref, *, n_feat, k_pad, n_planes):
    # g_ref: (tb, n_feat) int32   global row ids (feature idx + table row offset)
    # w_ref: (n_planes, k_pad, d_pad) bf16  bf16 planes of the block-diag table
    # o_ref: (tb, d_pad)  f32
    g = g_ref[...]
    tb = g.shape[0]
    col = jax.lax.broadcasted_iota(jnp.int32, (tb, k_pad), 1)

    # Concatenated one-hot over all (disjoint) feature segments: bool compares
    # merged with logical_or, a SINGLE cast at the end (exact 0/1 in bf16).
    mask = col == g[:, 0:1]
    for i in range(1, n_feat):                       # n_feat is small; unrolled
        mask = jnp.logical_or(mask, col == g[:, i:i + 1])
    onehot = mask.astype(jnp.bfloat16)

    # 3 bf16 MXU passes accumulated in f32 == every embedding lookup + concat.
    # Block-diagonal structure => exactly one non-zero term per output column,
    # so each pass is an exact row copy of that bf16 plane.
    out = jnp.dot(onehot, w_ref[0], preferred_element_type=jnp.float32)
    for p in range(1, n_planes):
        out = out + jnp.dot(onehot, w_ref[p], preferred_element_type=jnp.float32)
    o_ref[...] = out


def init_cat_embedding_params(key, categories, d_embed_max=100):
    """Per-feature embedding tables matching nn.Embedding's N(0,1) init."""
    d_embed_list = [min(max(int(c ** 0.5), 2), d_embed_max) for c in categories]
    tables = []
    for c, d in zip(categories, d_embed_list):
        key, sub = jax.random.split(key)
        tables.append(jax.random.normal(sub, (c, d), dtype=jnp.float32))
    return tables, d_embed_list


def pack_block_diag_bf16_planes(tables, n_planes=3):
    """Pack all tables into a zero-padded block-diagonal weight, split into
    n_planes bf16 planes whose sum reproduces the f32 weight (~1e-7 rel)."""
    k_total = sum(t.shape[0] for t in tables)
    d_total = sum(t.shape[1] for t in tables)
    k_pad = _round_up(k_total, 8)        # sublane-aligned contraction dim
    d_pad = _round_up(d_total, 128)      # lane-dense output columns
    w = jnp.zeros((k_pad, d_pad), jnp.float32)
    row_offsets = []
    r = c = 0
    for t in tables:
        w = w.at[r:r + t.shape[0], c:c + t.shape[1]].set(t)
        row_offsets.append(r)
        r += t.shape[0]
        c += t.shape[1]
    planes = []
    resid = w
    for _ in range(n_planes):
        p = resid.astype(jnp.bfloat16)
        planes.append(p)
        resid = resid - p.astype(jnp.float32)
    w_planes = jnp.stack(planes, axis=0)             # (n_planes, k_pad, d_pad)
    return w_planes, jnp.asarray(row_offsets, dtype=jnp.int32), d_total


def cat_embedding_sqrt_forward(x_cat, w_planes, row_offsets, d_cat_sum, *, tb=256):
    """Fused CatEmbeddingSqrt forward: one pallas_call for the whole module.

    Note: out-of-range category indices silently yield zeros for that feature's
    segment (PyTorch nn.Embedding would raise) -- validate upstream.
    """
    B, n_feat = x_cat.shape
    n_planes, k_pad, d_pad = w_planes.shape

    # MXU-filling batch tile (256 for v6e/v7x; pass tb=128 on v5e), but never
    # larger than the (8-aligned) batch itself.
    tb = min(tb, _round_up(B, 8))
    b_pad = _round_up(B, tb)

    # Feature-local index -> global row id in the packed block-diagonal table.
    g = x_cat.astype(jnp.int32) + row_offsets[None, :]
    if b_pad != B:
        # Padded rows select row 0 of the packed table: harmless, sliced off.
        g = jnp.pad(g, ((0, b_pad - B), (0, 0)))

    kernel = functools.partial(
        _cat_embedding_kernel, n_feat=n_feat, k_pad=k_pad, n_planes=n_planes)

    cost = pl.CostEstimate(
        flops=2 * b_pad * k_pad * d_pad * n_planes,
        transcendentals=0,
        bytes_accessed=int(w_planes.size) * 2 + int(g.size) * 4 + b_pad * d_pad * 4,
    )

    # VMEM budget: double-buffered inputs/outputs + weight planes + one-hot,
    # with headroom; floored at the 32 MiB default, capped at 64 MiB (v7x-safe).
    w_bytes = n_planes * k_pad * d_pad * 2
    tile_bytes = tb * n_feat * 4 + tb * d_pad * 4 + tb * k_pad * 2
    vmem_limit = int(min(64 << 20,
                         max(32 << 20, 2 * (w_bytes + tile_bytes) + (4 << 20))))

    out_padded = pl.pallas_call(
        kernel,
        out_shape=jax.ShapeDtypeStruct((b_pad, d_pad), jnp.float32),
        grid_spec=pltpu.PrefetchScalarGridSpec(
            num_scalar_prefetch=0,
            grid=(b_pad // tb,),
            in_specs=[
                pl.BlockSpec((tb, n_feat), lambda i: (i, 0)),
                # Constant index_map: packed table stays VMEM-resident across
                # all batch tiles (DMA'd only once).
                pl.BlockSpec((n_planes, k_pad, d_pad), lambda i: (0, 0, 0)),
            ],
            out_specs=pl.BlockSpec((tb, d_pad), lambda i: (i, 0)),
        ),
        compiler_params=pltpu.CompilerParams(
            dimension_semantics=("parallel",),
            vmem_limit_bytes=vmem_limit,
        ),
        cost_estimate=cost,
    )(g, w_planes)

    # Slice off batch padding and lane padding.
    return out_padded[:B, :d_cat_sum]


if __name__ == "__main__":
    key = jax.random.PRNGKey(0)
    categories = [15, 37, 120, 900]     # -> d_embed = [3, 6, 10, 30], d_cat_sum = 49
    d_embed_max = 100
    B = 32

    key, k_tab, k_idx = jax.random.split(key, 3)
    tables, d_embed_list = init_cat_embedding_params(k_tab, categories, d_embed_max)
    w_planes, row_offsets, d_cat_sum = pack_block_diag_bf16_planes(tables)
    assert d_cat_sum == sum(d_embed_list)

    idx_keys = jax.random.split(k_idx, len(categories))
    x_cat = jnp.stack(
        [jax.random.randint(idx_keys[i], (B,), 0, categories[i], dtype=jnp.int32)
         for i in range(len(categories))],
        axis=1,
    )

    out = cat_embedding_sqrt_forward(x_cat, w_planes, row_offsets, d_cat_sum)
    out = jax.block_until_ready(out)

    # Pure-JAX reference: per-feature embedding gather + concat (== torch forward).
    ref = jnp.concatenate(
        [tables[i][x_cat[:, i]] for i in range(len(categories))], axis=1)

    assert out.shape == (B, d_cat_sum), out.shape
    err = float(jnp.max(jnp.abs(out - ref)))
    assert jnp.allclose(out, ref, atol=1e-5, rtol=1e-5), err

    print("KERNEL_OK")
</pallas_src>

<mosaic_0001>
module attributes {stable_mosaic.version = 11 : i64} {
  func.func @_cat_embedding_kernel(%arg0: i32, %arg1: memref<32x4xi32, #tpu.memory_space<vmem>>, %arg2: memref<3x1072x128xbf16, #tpu.memory_space<vmem>>, %arg3: memref<32x128xf32, #tpu.memory_space<vmem>>) attributes {dimension_semantics = [#tpu.dimension_semantics<parallel>], iteration_bounds = array<i64: 1>, scalar_prefetch = 0 : i64, scratch_operands = 0 : i64, tpu.core_type = #tpu.core_type<tc>, window_params = [{transform_indices = @transform_0, window_bounds = array<i64: 32, 4>}, {pipeline_mode = #tpu.pipeline_mode<synchronous>, transform_indices = @transform_1, window_bounds = array<i64: 3, 1072, 128>}, {transform_indices = @transform_2, window_bounds = array<i64: 32, 128>}]} {
    %c0 = arith.constant 0 : index
    %c0_0 = arith.constant 0 : index
    %0 = vector.load %arg1[%c0, %c0_0] : memref<32x4xi32, #tpu.memory_space<vmem>>, vector<32x4xi32>
    %1 = tpu.iota {dimensions = array<i32: 1>} : vector<32x1072xi32>
    %2 = vector.extract_strided_slice %0 {offsets = [0, 0], sizes = [32, 1], strides = [1, 1]} : vector<32x4xi32> to vector<32x1xi32>
    %3 = vector.broadcast %2 : vector<32x1xi32> to vector<32x1072xi32>
    %4 = arith.cmpi eq, %1, %3 : vector<32x1072xi32>
    %5 = vector.extract_strided_slice %0 {offsets = [0, 1], sizes = [32, 1], strides = [1, 1]} : vector<32x4xi32> to vector<32x1xi32>
    %6 = vector.broadcast %5 : vector<32x1xi32> to vector<32x1072xi32>
    %7 = arith.cmpi eq, %1, %6 : vector<32x1072xi32>
    %8 = arith.ori %4, %7 : vector<32x1072xi1>
    %9 = vector.extract_strided_slice %0 {offsets = [0, 2], sizes = [32, 1], strides = [1, 1]} : vector<32x4xi32> to vector<32x1xi32>
    %10 = vector.broadcast %9 : vector<32x1xi32> to vector<32x1072xi32>
    %11 = arith.cmpi eq, %1, %10 : vector<32x1072xi32>
    %12 = arith.ori %8, %11 : vector<32x1072xi1>
    %13 = vector.extract_strided_slice %0 {offsets = [0, 3], sizes = [32, 1], strides = [1, 1]} : vector<32x4xi32> to vector<32x1xi32>
    %14 = vector.broadcast %13 : vector<32x1xi32> to vector<32x1072xi32>
    %15 = arith.cmpi eq, %1, %14 : vector<32x1072xi32>
    %16 = arith.ori %12, %15 : vector<32x1072xi1>
    %17 = arith.extui %16 : vector<32x1072xi1> to vector<32x1072xi32>
    %18 = arith.sitofp %17 : vector<32x1072xi32> to vector<32x1072xf32>
    %19 = arith.truncf %18 : vector<32x1072xf32> to vector<32x1072xbf16>
    %c0_1 = arith.constant 0 : index
    %c0_2 = arith.constant 0 : index
    %c0_3 = arith.constant 0 : index
    %20 = vector.load %arg2[%c0_1, %c0_2, %c0_3] : memref<3x1072x128xbf16, #tpu.memory_space<vmem>>, vector<1x1072x128xbf16>
    %21 = vector.shape_cast %20 : vector<1x1072x128xbf16> to vector<1072x128xbf16>
    %cst = arith.constant dense<0.000000e+00> : vector<32x128xf32>
    %22 = tpu.matmul %19, %21, %cst {dimension_numbers = #tpu.dot_dimension_numbers<[1], [0], [0], [1], [0, 0, 1, 1], [], []>} : vector<32x1072xbf16>, vector<1072x128xbf16>, vector<32x128xf32> -> vector<32x128xf32>
    %c1 = arith.constant 1 : index
    %c0_4 = arith.constant 0 : index
    %c0_5 = arith.constant 0 : index
    %23 = vector.load %arg2[%c1, %c0_4, %c0_5] : memref<3x1072x128xbf16, #tpu.memory_space<vmem>>, vector<1x1072x128xbf16>
    %24 = vector.shape_cast %23 : vector<1x1072x128xbf16> to vector<1072x128xbf16>
    %cst_6 = arith.constant dense<0.000000e+00> : vector<32x128xf32>
    %25 = tpu.matmul %19, %24, %cst_6 {dimension_numbers = #tpu.dot_dimension_numbers<[1], [0], [0], [1], [0, 0, 1, 1], [], []>} : vector<32x1072xbf16>, vector<1072x128xbf16>, vector<32x128xf32> -> vector<32x128xf32>
    %26 = arith.addf %22, %25 : vector<32x128xf32>
    %c2 = arith.constant 2 : index
    %c0_7 = arith.constant 0 : index
    %c0_8 = arith.constant 0 : index
    %27 = vector.load %arg2[%c2, %c0_7, %c0_8] : memref<3x1072x128xbf16, #tpu.memory_space<vmem>>, vector<1x1072x128xbf16>
    %28 = vector.shape_cast %27 : vector<1x1072x128xbf16> to vector<1072x128xbf16>
    %cst_9 = arith.constant dense<0.000000e+00> : vector<32x128xf32>
    %29 = tpu.matmul %19, %28, %cst_9 {dimension_numbers = #tpu.dot_dimension_numbers<[1], [0], [0], [1], [0, 0, 1, 1], [], []>} : vector<32x1072xbf16>, vector<1072x128xbf16>, vector<32x128xf32> -> vector<32x128xf32>
    %30 = arith.addf %26, %29 : vector<32x128xf32>
    %c0_10 = arith.constant 0 : index
    %c0_11 = arith.constant 0 : index
    %31 = vector.load %arg3[%c0_10, %c0_11] : memref<32x128xf32, #tpu.memory_space<vmem>>, vector<32x128xf32>
    tpu.vector_store %arg3[%c0_10, %c0_11], %30 {strides = array<i32>} : memref<32x128xf32, #tpu.memory_space<vmem>>, vector<32x128xf32>,
    return
  }
  func.func @transform_0(%arg0: i32) -> (i32, i32) {
    %c0_i32 = arith.constant 0 : i32
    %c0_i32_0 = arith.constant 0 : i32
    return %arg0, %c0_i32 : i32, i32
  }
  func.func @transform_1(%arg0: i32) -> (i32, i32, i32) {
    %c0_i32 = arith.constant 0 : i32
    %c0_i32_0 = arith.constant 0 : i32
    %c0_i32_1 = arith.constant 0 : i32
    %c0_i32_2 = arith.constant 0 : i32
    return %c0_i32, %c0_i32_0, %c0_i32_1 : i32, i32, i32
  }
  func.func @transform_2(%arg0: i32) -> (i32, i32) {
    %c0_i32 = arith.constant 0 : i32
    %c0_i32_0 = arith.constant 0 : i32
    return %arg0, %c0_i32 : i32, i32
  }
}

</mosaic_0001>

<bundles_post_ra>
// kernel: tpu_custom_call.1
= control target key start
LH: loop header
LB: loop body
LE: loop exit
PB: predicated region body
PF: predicated region fallthrough
CT: control target
= control target key end

     0   :  { %7 = vsyncpa [#allocation3], 0  ;;  %s4692_s0 = inlined_call_operand.vmem [shape: s32[32,4], index: 0, kind: input, shape index: {}]   ;;  %s4693_s1 = inlined_call_operand.hbm [shape: bf16[3,1072,128], index: 1, kind: input, shape index: {}]   ;;  %s4694_s2 = inlined_call_operand.hbm [shape: f32[32,128], index: 2, kind: output, shape index: {}]  }
   0x1   :  { %8 = vsyncpa [#allocation4], 0  ;;  %s15_s11 = sshll.u32 %s4693_s1, 4  ;;  %s3819_s12 = smov [#allocation2]   ;;  %s16_s11 = int_to_ptr.hbm [resolvable:$true] %s15_s11 }
   0x2   :  { %s17_s13 = sshll.u32 %s3819_s12, 4  ;;  %s3820_s14 = smov 64   ;;  %s18_s13 = int_to_ptr.vmem [resolvable:$true] %s17_s13 }
   0x3   :  { %s3821_s15 = smov 4  }
   0x4   :  { %23 = dma.hbm_to_vmem [thread:$0]  %s16_s11, 25728, %s18_s13, [#allocation3], %s3820_s14, %s3820_s14, %s3821_s15  }
   0x5   :  { %3815 = dma.done.wait [#allocation3], 25728  }
   0x6   :  { %3816 = vsyncadd [#allocation3], 4294941568  ;;  %v3822_v0 = vmov 1   ;;  %v3823_v1 = vmov 0   ;;  %v3824_v2 = vmov 2   ;;  %v29_v3 = vld [vmem:[%s4692_s0] sm:$0xff]  ;;  %v33_v42 = vlaneseq }
   0x7   :  { %3754 = vset.pattern.permute.xlu1 %v3822_v0  ;;  %3753 = vset.pattern.permute.xlu0 %v3823_v1  ;;  %v30_v4 = vld [vmem:[%s4692_s0 + $0x8] sm:$0xff]  ;;  %v3825_v5 = vmov 3   ;;  %v31_v6 = vld [vmem:[%s4692_s0 + $0x10] sm:$0xff]  ;;  %v32_v7 = vld [vmem:[%s4692_s0 + $0x18] sm:$0xff]  ;;  %s3828_s0 = smov [#allocation5]   ;;  %s2577_s26 = sshll.u32 %s4694_s2, 4  ;;  %s2578_s26 = int_to_ptr.hbm [resolvable:$true] %s2577_s26 }
   0x8   :  { %3755 = vset.pattern.permute.xlu2 %v3824_v2  ;;  %92 = vperm.xlu1 %3754, %v29_v3   ;;  %v3606_v8 = vld [vmem:[#allocation2 + $0x250] sm:$0xff]  ;;  %v3605_v12 = vld [vmem:[#allocation2 + $0x248] sm:$0xff]  ;;  %v3604_v16 = vld [vmem:[#allocation2 + $0x240] sm:$0xff]  ;;  %v3865_v43 = vand.u32 127, %v33_v42  ;;  %s2575_s23 = sshll.u32 %s3828_s0, 4  ;;  %s3829_s27 = smov 128   ;;  %s2576_s23 = int_to_ptr.vmem [resolvable:$true] %s2575_s23 }
   0x9   :  { %44 = vperm.xlu0 %3753, %v29_v3   ;;  %176 = vperm.xlu2 %3755, %v29_v3   ;;  %v3614_v9 = vld [vmem:[#allocation2 + $0x290] sm:$0xff]  ;;  %v3613_v13 = vld [vmem:[#allocation2 + $0x288] sm:$0xff]  ;;  %v3612_v17 = vld [vmem:[#allocation2 + $0x280] sm:$0xff]  ;;  %s3830_s28 = smov 8  }
   0xa   :  { %v3622_v10 = vld [vmem:[#allocation2 + $0x2d0] sm:$0xff]  ;;  %1111 = vmatpush.bf16.msra.mxu0 %v3606_v8  ;;  %1130 = vmatpush.bf16.msra.mxu1 %v3614_v9  ;;  %v3621_v14 = vld [vmem:[#allocation2 + $0x2c8] sm:$0xff]  ;;  %v3620_v18 = vld [vmem:[#allocation2 + $0x2c0] sm:$0xff]  ;;  %v3874_v51 = vadd.s32 128, %v3865_v43  ;;  %v3877_v52 = vadd.s32 256, %v3865_v43  ;;  %v3884_v57 = vadd.s32 384, %v3865_v43 }
   0xb   :  { %v3630_v11 = vld [vmem:[#allocation2 + $0x310] sm:$0xff]  ;;  %1149 = vmatpush.bf16.msra.mxu2 %v3622_v10  ;;  %v3629_v15 = vld [vmem:[#allocation2 + $0x308] sm:$0xff]  ;;  %v3628_v19 = vld [vmem:[#allocation2 + $0x300] sm:$0xff] }
   0xc   :  { %1168 = vmatpush.bf16.msra.mxu3 %v3630_v11  ;;  %v3603_v20 = vld [vmem:[#allocation2 + $0x238] sm:$0xff]  ;;  %v3602_v24 = vld [vmem:[#allocation2 + $0x230] sm:$0xff]  ;;  %v3601_v28 = vld [vmem:[#allocation2 + $0x228] sm:$0xff] }
   0xd   :  { %v3611_v21 = vld [vmem:[#allocation2 + $0x278] sm:$0xff]  ;;  %v3610_v25 = vld [vmem:[#allocation2 + $0x270] sm:$0xff]  ;;  %v3609_v29 = vld [vmem:[#allocation2 + $0x268] sm:$0xff] }
   0xe   :  { %1112 = vmatpush.bf16.msra.mxu0 %v3605_v12  ;;  %1131 = vmatpush.bf16.msra.mxu1 %v3613_v13  ;;  %v3619_v22 = vld [vmem:[#allocation2 + $0x2b8] sm:$0xff]  ;;  %v3618_v26 = vld [vmem:[#allocation2 + $0x2b0] sm:$0xff]  ;;  %v3617_v30 = vld [vmem:[#allocation2 + $0x2a8] sm:$0xff]  ;;  %v4736_v13 = vmov 0  ;;  %v4784_v12 = vmov 0 }
   0xf   :  { %1150 = vmatpush.bf16.msra.mxu2 %v3621_v14  ;;  %v3627_v23 = vld [vmem:[#allocation2 + $0x2f8] sm:$0xff]  ;;  %v3626_v27 = vld [vmem:[#allocation2 + $0x2f0] sm:$0xff]  ;;  %v3625_v31 = vld [vmem:[#allocation2 + $0x2e8] sm:$0xff]  ;;  %v4738_v14 = vmov 0 }
  0x10   :  { %95 = vperm.xlu1 %3754, %v30_v4   ;;  %1169 = vmatpush.bf16.msra.mxu3 %v3629_v15  ;;  %v3600_v32 = vld [vmem:[#allocation2 + $0x220] sm:$0xff]  ;;  %v3599_v37 = vld [vmem:[#allocation2 + $0x218] sm:$0xff]  ;;  %v3654_v44 = vld [vmem:[#allocation2 + $0x3d0] sm:$0xff] }
  0x11   :  { %47 = vperm.xlu0 %3753, %v30_v4   ;;  %179 = vperm.xlu2 %3755, %v30_v4   ;;  %v3608_v33 = vld [vmem:[#allocation2 + $0x260] sm:$0xff]  ;;  %v3607_v38 = vld [vmem:[#allocation2 + $0x258] sm:$0xff]  ;;  %v3638_v45 = vld [vmem:[#allocation2 + $0x350] sm:$0xff] }
  0x12   :  { %1113 = vmatpush.bf16.msra.mxu0 %v3604_v16  ;;  %1132 = vmatpush.bf16.msra.mxu1 %v3612_v17  ;;  %v3616_v34 = vld [vmem:[#allocation2 + $0x2a0] sm:$0xff]  ;;  %v3615_v39 = vld [vmem:[#allocation2 + $0x298] sm:$0xff]  ;;  %v3646_v46 = vld [vmem:[#allocation2 + $0x390] sm:$0xff] }
  0x13   :  { %1151 = vmatpush.bf16.msra.mxu2 %v3620_v18  ;;  %v3624_v35 = vld [vmem:[#allocation2 + $0x2e0] sm:$0xff]  ;;  %v3623_v40 = vld [vmem:[#allocation2 + $0x2d8] sm:$0xff]  ;;  %v3662_v49 = vld [vmem:[#allocation2 + $0x410] sm:$0xff] }
  0x14   :  { %1170 = vmatpush.bf16.msra.mxu3 %v3628_v19  ;;  %v3653_v53 = vld [vmem:[#allocation2 + $0x3c8] sm:$0xff]  ;;  %v3652_v58 = vld [vmem:[#allocation2 + $0x3c0] sm:$0xff]  ;;  %v3635_v8 = vld [vmem:[#allocation2 + $0x338] sm:$0xff] }
  0x15   :  { %v3637_v54 = vld [vmem:[#allocation2 + $0x348] sm:$0xff]  ;;  %v3636_v59 = vld [vmem:[#allocation2 + $0x340] sm:$0xff]  ;;  %v3643_v9 = vld [vmem:[#allocation2 + $0x378] sm:$0xff] }
  0x16   :  { %1114 = vmatpush.bf16.msra.mxu0 %v3603_v20  ;;  %1133 = vmatpush.bf16.msra.mxu1 %v3611_v21  ;;  %v3645_v55 = vld [vmem:[#allocation2 + $0x388] sm:$0xff]  ;;  %v3644_v61 = vld [vmem:[#allocation2 + $0x380] sm:$0xff]  ;;  %v3659_v11 = vld [vmem:[#allocation2 + $0x3f8] sm:$0xff]  ;;  %v4746_v20 = vmov 0 }
  0x17   :  { %1152 = vmatpush.bf16.msra.mxu2 %v3619_v22  ;;  %v3661_v56 = vld [vmem:[#allocation2 + $0x408] sm:$0xff]  ;;  %v3660_v62 = vld [vmem:[#allocation2 + $0x400] sm:$0xff]  ;;  %v3826_v22 = vmov 1.0|1.0   ;;  %v3655_v60 = vld [vmem:[#allocation2 + $0x3d8] sm:$0xff] }
  0x18   :  { %3757 = vset.pattern.permute.xlu1 %v3825_v5  ;;  %1171 = vmatpush.bf16.msra.mxu3 %v3627_v23  ;;  %v4749_v23 = vmov 0  ;;  %v3555_v10 = vld [vmem:[#allocation2 + $0xb8] sm:$0xff]  ;;  %v3545_v17 = vld [vmem:[#allocation2 + $0x68] sm:$0xff] }
  0x19   :  { %3756 = vset.pattern.permute.xlu0 %v3825_v5  ;;  %263 = vperm.xlu1 %3757, %v30_v4   ;;  %v3537_v18 = vld [vmem:[#allocation2 + $0x28] sm:$0xff]  ;;  %v3563_v4 = vld [vmem:[#allocation2 + $0xf8] sm:$0xff] }
  0x1a   :  { %260 = vperm.xlu0 %3756, %v29_v3   ;;  %3758 = vset.pattern.permute.xlu2 %v3823_v1  ;;  %v3553_v19 = vld [vmem:[#allocation2 + $0xa8] sm:$0xff]  ;;  %v3579_v3 = vld [vmem:[#allocation2 + $0x178] sm:$0xff] }
  0x1b   :  { %50 = vperm.xlu2 %3758, %v31_v6   ;;  %1115 = vmatpush.bf16.msra.mxu0 %v3602_v24  ;;  %v3665_v42 = vld [vmem:[#allocation2 + $0x428] sm:$0xff] }
  0x1c   :  { %1134 = vmatpush.bf16.msra.mxu1 %v3610_v25  ;;  %1153 = vmatpush.bf16.msra.mxu2 %v3618_v26  ;;  %v3650_v26 = vld [vmem:[#allocation2 + $0x3b0] sm:$0xff] }
  0x1d   :  { %1172 = vmatpush.bf16.msra.mxu3 %v3626_v27  ;;  %v3634_v27 = vld [vmem:[#allocation2 + $0x330] sm:$0xff] }
  0x1f   :  { %1116 = vmatpush.bf16.msra.mxu0 %v3601_v28  ;;  %v4752_v28 = vmov 0 }
  0x20   :  { %1135 = vmatpush.bf16.msra.mxu1 %v3609_v29  ;;  %1154 = vmatpush.bf16.msra.mxu2 %v3617_v30  ;;  %v3642_v29 = vld [vmem:[#allocation2 + $0x370] sm:$0xff] }
  0x21   :  { %3759 = vset.pattern.permute.xlu1 %v3823_v1  ;;  %1173 = vmatpush.bf16.msra.mxu3 %v3625_v31  ;;  %v3658_v30 = vld [vmem:[#allocation2 + $0x3f0] sm:$0xff]  ;;  %v3649_v31 = vld [vmem:[#allocation2 + $0x3a8] sm:$0xff]  ;;  %v3548_v1 = vld [vmem:[#allocation2 + $0x80] sm:$0xff] }
  0x22   :  { %3761 = vset.pattern.permute.xlu0 %v3822_v0  ;;  %53 = vperm.xlu1 %3759, %v32_v7  }
  0x23   :  { %101 = vperm.xlu0 %3761, %v32_v7   ;;  %3760 = vset.pattern.permute.xlu2 %v3822_v0 }
  0x24   :  { %98 = vperm.xlu2 %3760, %v31_v6   ;;  %1117 = vmatpush.bf16.msra.mxu0 %v3600_v32  ;;  %v3633_v32 = vld [vmem:[#allocation2 + $0x328] sm:$0xff] }
  0x25   :  { %1136 = vmatpush.bf16.msra.mxu1 %v3608_v33  ;;  %1155 = vmatpush.bf16.msra.mxu2 %v3616_v34  ;;  %v4754_v33 = vmov 0  ;;  %v3641_v34 = vld [vmem:[#allocation2 + $0x368] sm:$0xff] }
  0x26   :  { %1174 = vmatpush.bf16.msra.mxu3 %v3624_v35  ;;  %v3657_v35 = vld [vmem:[#allocation2 + $0x3e8] sm:$0xff] }
  0x28   :  { %1118 = vmatpush.bf16.msra.mxu0 %v3599_v37 }
  0x29   :  { %1137 = vmatpush.bf16.msra.mxu1 %v3607_v38  ;;  %1156 = vmatpush.bf16.msra.mxu2 %v3615_v39  ;;  %v3648_v39 = vld [vmem:[#allocation2 + $0x3a0] sm:$0xff]  ;;  %v3543_v38 = vld [vmem:[#allocation2 + $0x58] sm:$0xff] }
  0x2a   :  { %3762 = vset.pattern.permute.xlu1 %v3824_v2  ;;  %1175 = vmatpush.bf16.msra.mxu3 %v3623_v40  ;;  %v3632_v40 = vld [vmem:[#allocation2 + $0x320] sm:$0xff] }
  0x2b   :  { %3766 = vset.pattern.permute.xlu0 %v3825_v5  ;;  %182 = vperm.xlu1 %3762, %v31_v6  }
  0x2c   :  { %3763 = vset.pattern.permute.xlu2 %v3824_v2  ;;  %1187 = vmatpush.bf16.msrb.mxu0 %v3638_v45  ;;  %v3651_v2 = vld [vmem:[#allocation2 + $0x3b8] sm:$0xff]  ;;  %v3656_v45 = vld [vmem:[#allocation2 + $0x3e0] sm:$0xff] }
  0x2d   :  { %185 = vperm.xlu2 %3763, %v32_v7   ;;  %1225 = vmatpush.bf16.msrb.mxu2 %v3654_v44  ;;  %v3640_v44 = vld [vmem:[#allocation2 + $0x360] sm:$0xff] }
  0x2e   :  { %1206 = vmatpush.bf16.msrb.mxu1 %v3646_v46  ;;  %1244 = vmatpush.bf16.msrb.mxu3 %v3662_v49  ;;  %v4792_v49 = vmov 0 }
  0x30   :  { %1188 = vmatpush.bf16.msrb.mxu0 %v3637_v54  ;;  %v3647_v54 = vld [vmem:[#allocation2 + $0x398] sm:$0xff] }
  0x31   :  { %1226 = vmatpush.bf16.msrb.mxu2 %v3653_v53  ;;  %v3550_v53 = vld [vmem:[#allocation2 + $0x90] sm:$0xff] }
  0x32   :  { %1207 = vmatpush.bf16.msrb.mxu1 %v3645_v55  ;;  %1245 = vmatpush.bf16.msrb.mxu3 %v3661_v56  ;;  %v3631_v55 = vld [vmem:[#allocation2 + $0x318] sm:$0xff]  ;;  %v3533_v56 = vld [vmem:[#allocation2 + $0x8] sm:$0xff] }
  0x33   :  { %3764 = vset.pattern.permute.xlu1 %v3825_v5 }
  0x34   :  { %266 = vperm.xlu1 %3764, %v31_v6   ;;  %1189 = vmatpush.bf16.msrb.mxu0 %v3636_v59  ;;  %v3639_v59 = vld [vmem:[#allocation2 + $0x358] sm:$0xff] }
  0x35   :  { %3765 = vset.pattern.permute.xlu2 %v3825_v5  ;;  %1227 = vmatpush.bf16.msrb.mxu2 %v3652_v58  ;;  %v3549_v58 = vld [vmem:[#allocation2 + $0x88] sm:$0xff]  ;;  %v3716_v5 = vld [vmem:[#allocation2 + $0x5c0] sm:$0xff] }
  0x36   :  { %269 = vperm.xlu2 %3765, %v32_v7   ;;  %1208 = vmatpush.bf16.msrb.mxu1 %v3644_v61  ;;  %v4274_v7 = vadd.s32 512, %v3865_v43  ;;  %v3540_v61 = vld [vmem:[#allocation2 + $0x40] sm:$0xff] }
  0x37   :  { %1246 = vmatpush.bf16.msrb.mxu3 %v3660_v62  ;;  %v3532_v62 = vld [vmem:[#allocation2] sm:$0xff] }
  0x38   :  { %1190 = vmatpush.bf16.msrb.mxu0 %v3635_v8  ;;  %v3547_v8 = vld [vmem:[#allocation2 + $0x78] sm:$0xff] }
  0x39   :  { %1228 = vmatpush.bf16.msrb.mxu2 %v3651_v2 }
  0x3a   :  { %1209 = vmatpush.bf16.msrb.mxu1 %v3643_v9  ;;  %v3539_v9 = vld [vmem:[#allocation2 + $0x38] sm:$0xff] }
  0x3b   :  { %1247 = vmatpush.bf16.msrb.mxu3 %v3659_v11  ;;  %v3538_v11 = vld [vmem:[#allocation2 + $0x30] sm:$0xff] }
  0x3c   :  { %1191 = vmatpush.bf16.msrb.mxu0 %v3634_v27  ;;  %v3544_v27 = vld [vmem:[#allocation2 + $0x60] sm:$0xff] }
  0x3d   :  { %1229 = vmatpush.bf16.msrb.mxu2 %v3650_v26  ;;  %v4786_v26 = vmov 0 }
  0x3e   :  { %1210 = vmatpush.bf16.msrb.mxu1 %v3642_v29  ;;  %v3536_v29 = vld [vmem:[#allocation2 + $0x20] sm:$0xff] }
  0x3f   :  { %1248 = vmatpush.bf16.msrb.mxu3 %v3658_v30  ;;  %v4332_v30 = vadd.s32 768, %v3865_v43 }
  0x40   :  { %1192 = vmatpush.bf16.msrb.mxu0 %v3633_v32  ;;  %v4788_v32 = vmov 0 }
  0x41   :  { %1230 = vmatpush.bf16.msrb.mxu2 %v3649_v31  ;;  %v3552_v31 = vld [vmem:[#allocation2 + $0xa0] sm:$0xff] }
  0x42   :  { %1211 = vmatpush.bf16.msrb.mxu1 %v3641_v34  ;;  %v4358_v34 = vadd.s32 896, %v3865_v43 }
  0x43   :  { %1249 = vmatpush.bf16.msrb.mxu3 %v3657_v35 }
  0x44   :  { %1193 = vmatpush.bf16.msrb.mxu0 %v3632_v40  ;;  %v3551_v40 = vld [vmem:[#allocation2 + $0x98] sm:$0xff] }
  0x45   :  { %1231 = vmatpush.bf16.msrb.mxu2 %v3648_v39  ;;  %v3535_v39 = vld [vmem:[#allocation2 + $0x18] sm:$0xff] }
  0x46   :  { %1212 = vmatpush.bf16.msrb.mxu1 %v3640_v44  ;;  %v3542_v44 = vld [vmem:[#allocation2 + $0x50] sm:$0xff] }
  0x47   :  { %1250 = vmatpush.bf16.msrb.mxu3 %v3656_v45  ;;  %v3534_v45 = vld [vmem:[#allocation2 + $0x10] sm:$0xff] }
  0x48   :  { %1194 = vmatpush.bf16.msrb.mxu0 %v3631_v55  ;;  %v3541_v55 = vld [vmem:[#allocation2 + $0x48] sm:$0xff] }
  0x49   :  { %1232 = vmatpush.bf16.msrb.mxu2 %v3647_v54  ;;  %v3664_v54 = vld [vmem:[#allocation2 + $0x420] sm:$0xff] }
  0x4a   :  { %1213 = vmatpush.bf16.msrb.mxu1 %v3639_v59  ;;  %v3663_v59 = vld [vmem:[#allocation2 + $0x418] sm:$0xff] }
  0x4b   :  { %1251 = vmatpush.bf16.msrb.mxu3 %v3655_v60 }
  0x63   :  { %v3861_v36 = vpop.permute.xlu2 %176 }
  0x64   :  { %vm187_vm5 = vcmp.eq.s32.totalorder %v3865_v43, %v3861_v36 }
  0x6b   :  { %v3863_v41 = vpop.permute.xlu2 %179 }
  0x75   :  { %v3871_v50 = vpop.permute.xlu2 %50 }
  0x7a   :  { %v3867_v47 = vpop.permute.xlu1 %92 }
  0x7b   :  { %v3869_v48 = vpop.permute.xlu0 %44  ;;  %vm103_vm1 = vcmp.eq.s32.totalorder %v3865_v43, %v3867_v47  ;;  %vm104_vm3 = vcmp.eq.s32.totalorder %v3874_v51, %v3867_v47  ;;  %vm105_vm7 = vcmp.eq.s32.totalorder %v3877_v52, %v3867_v47  ;;  %vm106_vm12 = vcmp.eq.s32.totalorder %v3884_v57, %v3867_v47 }
  0x7c   :  { %vm55_vm0 = vcmp.eq.s32.totalorder %v3865_v43, %v3869_v48  ;;  %vm56_vm2 = vcmp.eq.s32.totalorder %v3874_v51, %v3869_v48  ;;  %vm57_vm6 = vcmp.eq.s32.totalorder %v3877_v52, %v3869_v48  ;;  %vm58_vm11 = vcmp.eq.s32.totalorder %v3884_v57, %v3869_v48 }
  0x7d   :  { %vm3890_vm4 = vmor %vm55_vm0, %vm103_vm1  ;;  %vm188_vm0 = vcmp.eq.s32.totalorder %v3874_v51, %v3861_v36 }
  0x7e   :  { %vm3914_vm10 = vmor %vm56_vm2, %vm104_vm3  ;;  %v3951_v6 = vpop.permute.xlu2 %98 }
  0x7f   :  { %vm3927_vm13 = vmor %vm3890_vm4, %vm187_vm5 }
  0x80   :  { %vm3943_vm1 = vmor %vm57_vm6, %vm105_vm7  ;;  %vm196_vm6 = vcmp.eq.s32.totalorder %v3865_v43, %v3863_v41 }
  0x81   :  { %vm3963_vm5 = vmor %vm58_vm11, %vm106_vm12 }
  0x82   :  { %v3900_v63 = vpop.permute.xlu1 %95 }
  0x83   :  { %v3902_v0 = vpop.permute.xlu0 %47  ;;  %vm112_vm9 = vcmp.eq.s32.totalorder %v3865_v43, %v3900_v63  ;;  %vm113_vm15 = vcmp.eq.s32.totalorder %v3874_v51, %v3900_v63  ;;  %vm114_vm4 = vcmp.eq.s32.totalorder %v3877_v52, %v3900_v63 }
  0x84   :  { %vm64_vm8 = vcmp.eq.s32.totalorder %v3865_v43, %v3902_v0  ;;  %vm65_vm14 = vcmp.eq.s32.totalorder %v3874_v51, %v3902_v0  ;;  %vm66_vm3 = vcmp.eq.s32.totalorder %v3877_v52, %v3902_v0  ;;  %vm67_vm12 = vcmp.eq.s32.totalorder %v3884_v57, %v3902_v0 }
  0x85   :  { %vm3947_vm2 = vmor %vm64_vm8, %vm112_vm9  ;;  %vm189_vm9 = vcmp.eq.s32.totalorder %v3877_v52, %v3861_v36 }
  0x86   :  { %vm149_vm7 = vmor %vm65_vm14, %vm113_vm15  ;;  %vm197_vm14 = vcmp.eq.s32.totalorder %v3874_v51, %v3863_v41 }
  0x87   :  { %vm3974_vm8 = vmor %vm3914_vm10, %vm188_vm0  ;;  %vm115_vm10 = vcmp.eq.s32.totalorder %v3884_v57, %v3900_v63  ;;  %v4048_v21 = vpop.permute.xlu2 %185 }
  0x88   :  { %vm3982_vm11 = vmor %vm3947_vm2, %vm196_vm6  ;;  %vm190_vm6 = vcmp.eq.s32.totalorder %v3884_v57, %v3861_v36 }
  0x89   :  { %vm150_vm15 = vmor %vm66_vm3, %vm114_vm4  ;;  %vm198_vm3 = vcmp.eq.s32.totalorder %v3877_v52, %v3863_v41 }
  0x8a   :  { %vm3998_vm0 = vmor %vm149_vm7, %vm197_vm14 }
  0x8b   :  { %v4737_v13 = vsel %vm3998_vm0, 4294967295, %v4736_v13  ;;  %vm4004_vm2 = vmor %vm3943_vm1, %vm189_vm9  ;;  %v4010_v15 = vpop.permute.xlu1 %263  ;;  %vm199_vm0 = vcmp.eq.s32.totalorder %v3884_v57, %v3863_v41 }
  0x8c   :  { %v4739_v14 = vsel %vm4004_vm2, 4294967295, %v4738_v14  ;;  %v4012_v16 = vpop.permute.xlu0 %260  ;;  %vm151_vm4 = vmor %vm67_vm12, %vm115_vm10  ;;  %vm280_vm1 = vcmp.eq.s32.totalorder %v3865_v43, %v4010_v15 }
  0x8d   :  { %vm271_vm7 = vcmp.eq.s32.totalorder %v3865_v43, %v4012_v16  ;;  %vm4020_vm9 = vmor %vm150_vm15, %vm198_vm3  ;;  %vm272_vm2 = vcmp.eq.s32.totalorder %v3874_v51, %v4012_v16  ;;  %vm281_vm15 = vcmp.eq.s32.totalorder %v3874_v51, %v4010_v15 }
  0x8e   :  { %vm307_vm14 = vmor %vm3927_vm13, %vm271_vm7 }
  0x8f   :  { %vm4032_vm12 = vmor %vm3963_vm5, %vm190_vm6 }
  0x90   :  { %vm316_vm10 = vmor %vm3982_vm11, %vm280_vm1  ;;  %vm273_vm11 = vcmp.eq.s32.totalorder %v3877_v52, %v4012_v16  ;;  %vm4751_vm1 = vnez %v4739_v14  ;;  %v4111_v37 = vpop.permute.xlu2 %269  ;;  %v4306_v14 = vadd.s32 640, %v3865_v43 }
  0x91   :  { %vm4040_vm3 = vmor %vm151_vm4, %vm199_vm0  ;;  %vm4748_vm0 = vnez %v4737_v13  ;;  %vm282_vm4 = vcmp.eq.s32.totalorder %v3877_v52, %v4010_v15  ;;  %v3554_v13 = vld [vmem:[#allocation2 + $0xb0] sm:$0xff] }
  0x92   :  { %vm4044_vm13 = vmpackc.low %vm316_vm10, %vm307_vm14  ;;  %vm283_vm10 = vcmp.eq.s32.totalorder %v3884_v57, %v4010_v15 }
  0x93   :  { %v4747_v20 = vsel %vm4044_vm13, 4294967295, %v4746_v20  ;;  %2895 = vmatmul.msk.bf16.vlgmr.msra.gmra.mxu0 %vm4044_vm13, %v3826_v22  ;;  %vm308_vm5 = vmor %vm3974_vm8, %vm272_vm2  ;;  %vm274_vm2 = vcmp.eq.s32.totalorder %v3884_v57, %v4012_v16  ;;  %vm124_vm13 = vcmp.eq.s32.totalorder %v3884_v57, %v3951_v6 }
  0x94   :  { %vm317_vm6 = vmor %vm4748_vm0, %vm281_vm15  ;;  %v4076_v24 = vpop.permute.xlu1 %53  ;;  %1268 = vmatpush.bf16.msra.mxu0 %v3665_v42 }
  0x95   :  { %vm4061_vm7 = vmpackc.low %vm317_vm6, %vm308_vm5  ;;  %v4078_v25 = vpop.permute.xlu0 %101  ;;  %vm82_vm5 = vcmp.eq.s32.totalorder %v3865_v43, %v4076_v24 }
  0x96   :  { %v4750_v23 = vsel %vm4061_vm7, 4294967295, %v4749_v23  ;;  %2899 = vmatmul.msk.bf16.vlgmr.msra.gmra.mxu1 %vm4061_vm7, %v3826_v22  ;;  %vm309_vm8 = vmor %vm4751_vm1, %vm273_vm11  ;;  %vm130_vm11 = vcmp.eq.s32.totalorder %v3865_v43, %v4078_v25  ;;  %vm214_vm1 = vcmp.eq.s32.totalorder %v3865_v43, %v4048_v21  ;;  %vm300_vm7 = vcmp.eq.s32.totalorder %v3877_v52, %v4111_v37 }
  0x97   :  { %vm318_vm14 = vmor %vm4020_vm9, %vm282_vm4  ;;  %vm121_vm4 = vcmp.eq.s32.totalorder %v3865_v43, %v3951_v6  ;;  %1684 = vmatpush.bf16.msra.mxu1 %v3539_v9  ;;  %v3587_v9 = vld [vmem:[#allocation2 + $0x1b8] sm:$0xff] }
  0x98   :  { %vm4080_vm15 = vmpackc.low %vm318_vm14, %vm309_vm8  ;;  %vm83_vm8 = vcmp.eq.s32.totalorder %v3874_v51, %v4076_v24  ;;  %1269 = vmatpush.bf16.msra.mxu0 %v3664_v54  ;;  %v3565_v54 = vld [vmem:[#allocation2 + $0x108] sm:$0xff] }
  0x99   :  { %v4753_v28 = vsel %vm4080_vm15, 4294967295, %v4752_v28  ;;  %2903 = vmatmul.msk.bf16.vlgmr.msra.gmra.mxu2 %vm4080_vm15, %v3826_v22  ;;  %vm310_vm9 = vmor %vm4032_vm12, %vm274_vm2  ;;  %vm73_vm12 = vcmp.eq.s32.totalorder %v3865_v43, %v3871_v50  ;;  %vm131_vm2 = vcmp.eq.s32.totalorder %v3874_v51, %v4078_v25  ;;  %vm123_vm15 = vcmp.eq.s32.totalorder %v3877_v52, %v3951_v6 }
  0x9a   :  { %vm319_vm0 = vmor %vm4040_vm3, %vm283_vm10  ;;  %vm74_vm10 = vcmp.eq.s32.totalorder %v3874_v51, %v3871_v50  ;;  %1703 = vmatpush.bf16.msra.mxu2 %v3547_v8  ;;  %v3571_v8 = vld [vmem:[#allocation2 + $0x138] sm:$0xff] }
  0x9b   :  { %vm4095_vm6 = vmpackc.low %vm319_vm0, %vm310_vm9  ;;  %vm122_vm9 = vcmp.eq.s32.totalorder %v3874_v51, %v3951_v6  ;;  %vm298_vm0 = vcmp.eq.s32.totalorder %v3865_v43, %v4111_v37  ;;  %1685 = vmatpush.bf16.msra.mxu1 %v3538_v11  ;;  %v3570_v11 = vld [vmem:[#allocation2 + $0x130] sm:$0xff] }
  0x9c   :  { %v4755_v33 = vsel %vm4095_vm6, 4294967295, %v4754_v33  ;;  %2907 = vmatmul.msk.bf16.vlgmr.msra.gmra.mxu3 %vm4095_vm6, %v3826_v22  ;;  %vm166_vm3 = vmor %vm82_vm5, %vm130_vm11  ;;  %vm215_vm11 = vcmp.eq.s32.totalorder %v3874_v51, %v4048_v21  ;;  %1270 = vmatpush.bf16.msra.mxu0 %v3663_v59  ;;  %v3598_v59 = vld [vmem:[#allocation2 + $0x210] sm:$0xff] }
  0x9d   :  { %vm4117_vm14 = vmor %vm73_vm12, %vm121_vm4  ;;  %v4131_v46 = vpop.permute.xlu1 %182  ;;  %1722 = vmatpush.bf16.msra.mxu3 %v3555_v10  ;;  %v3578_v10 = vld [vmem:[#allocation2 + $0x170] sm:$0xff] }
  0x9e   :  { %vm4125_vm5 = vmor %vm166_vm3, %vm214_vm1  ;;  %vm205_vm4 = vcmp.eq.s32.totalorder %v3865_v43, %v4131_v46  ;;  %vm206_vm1 = vcmp.eq.s32.totalorder %v3874_v51, %v4131_v46 }
  0x9f   :  { %vm167_vm12 = vmor %vm83_vm8, %vm131_vm2  ;;  %vm299_vm8 = vcmp.eq.s32.totalorder %v3874_v51, %v4111_v37  ;;  %vm75_vm2 = vcmp.eq.s32.totalorder %v3877_v52, %v3871_v50  ;;  %1686 = vmatpush.bf16.msra.mxu1 %v3537_v18  ;;  %v3569_v18 = vld [vmem:[#allocation2 + $0x128] sm:$0xff] }
  0xa0   :  { %vm4149_vm3 = vmor %vm74_vm10, %vm122_vm9 }
  0xa1   :  { %vm4155_vm6 = vmor %vm167_vm12, %vm215_vm11  ;;  %vm84_vm11 = vcmp.eq.s32.totalorder %v3877_v52, %v4076_v24  ;;  %vm132_vm12 = vcmp.eq.s32.totalorder %v3877_v52, %v4078_v25  ;;  %1723 = vmatpush.bf16.msra.mxu3 %v3554_v13  ;;  %v3586_v13 = vld [vmem:[#allocation2 + $0x1b0] sm:$0xff] }
  0xa2   :  { %vm4167_vm10 = vmor %vm4117_vm14, %vm205_vm4 }
  0xa3   :  { %vm4173_vm9 = vmor %vm4125_vm5, %vm298_vm0  ;;  %vm207_vm5 = vcmp.eq.s32.totalorder %v3877_v52, %v4131_v46  ;;  %1687 = vmatpush.bf16.msra.mxu1 %v3536_v29  ;;  %v4493_v29 = vadd.s32 1024, %v3865_v43 }
  0xa4   :  { %vm4186_vm14 = vmor %vm4149_vm3, %vm206_vm1  ;;  %vm216_vm3 = vcmp.eq.s32.totalorder %v3877_v52, %v4048_v21 }
  0xa5   :  { %vm4197_vm0 = vmor %vm4155_vm6, %vm299_vm8  ;;  %vm76_vm8 = vcmp.eq.s32.totalorder %v3884_v57, %v3871_v50  ;;  %1724 = vmatpush.bf16.msra.mxu3 %v3553_v19  ;;  %v4798_v19 = vmov 0 }
  0xa6   :  { %vm159_vm4 = vmor %vm75_vm2, %vm123_vm15  ;;  %v4219_v2 = vpop.permute.xlu1 %266 }
  0xa7   :  { %vm168_vm1 = vmor %vm84_vm11, %vm132_vm12  ;;  %vm289_vm11 = vcmp.eq.s32.totalorder %v3865_v43, %v4219_v2  ;;  %vm290_vm12 = vcmp.eq.s32.totalorder %v3874_v51, %v4219_v2  ;;  %v4780_v51 = vmov 0  ;;  %1688 = vmatpush.bf16.msra.mxu1 %v3535_v39  ;;  %v3584_v43 = vld [vmem:[#allocation2 + $0x1a0] sm:$0xff]  ;;  %v3558_v39 = vld [vmem:[#allocation2 + $0xd0] sm:$0xff] }
  0xa8   :  { %vm4211_vm6 = vmor %vm159_vm4, %vm207_vm5 }
  0xa9   :  { %vm252_vm15 = vmor %vm168_vm1, %vm216_vm3  ;;  %1725 = vmatpush.bf16.msra.mxu3 %v3552_v31  ;;  %v3560_v31 = vld [vmem:[#allocation2 + $0xe0] sm:$0xff] }
  0xaa   :  { %vm4221_vm2 = vmor %vm252_vm15, %vm300_vm7  ;;  %vm291_vm7 = vcmp.eq.s32.totalorder %v3877_v52, %v4219_v2  ;;  %v4782_v52 = vmov 0  ;;  %vm217_vm15 = vcmp.eq.s32.totalorder %v3884_v57, %v4048_v21 }
  0xab   :  { %vm4229_vm5 = vmor %vm76_vm8, %vm124_vm13  ;;  %1689 = vmatpush.bf16.msra.mxu1 %v3534_v45  ;;  %v3573_v45 = vld [vmem:[#allocation2 + $0x148] sm:$0xff] }
  0xac   :  { %vm325_vm4 = vmor %vm4167_vm10, %vm289_vm11  ;;  %vm85_vm10 = vcmp.eq.s32.totalorder %v3884_v57, %v4076_v24  ;;  %vm292_vm11 = vcmp.eq.s32.totalorder %v3884_v57, %v4219_v2 }
  0xad   :  { %vm4237_vm3 = vmpackc.low %vm4173_vm9, %vm325_vm4  ;;  %vm133_vm9 = vcmp.eq.s32.totalorder %v3884_v57, %v4078_v25  ;;  %1726 = vmatpush.bf16.msra.mxu3 %v3551_v40  ;;  %v3566_v40 = vld [vmem:[#allocation2 + $0x110] sm:$0xff] }
  0xae   :  { %2897 = vmatmul.msk.bf16.gmra.mxu0 %vm4237_vm3, %v3826_v22  ;;  %vm326_vm13 = vmor %vm4186_vm14, %vm290_vm12  ;;  %vm208_vm14 = vcmp.eq.s32.totalorder %v3884_v57, %v4131_v46  ;;  %vm301_vm12 = vcmp.eq.s32.totalorder %v3884_v57, %v4111_v37  ;;  %v3546_v57 = vld [vmem:[#allocation2 + $0x70] sm:$0xff] }
  0xaf   :  { %vm4250_vm1 = vmpackc.low %vm4197_vm0, %vm326_vm13  ;;  %vm59_vm13 = vcmp.eq.s32.totalorder %v4274_v7, %v3869_v48  ;;  %1704 = vmatpush.bf16.msra.mxu2 %v3546_v57  ;;  %1690 = vmatpush.bf16.msra.mxu1 %v3533_v56  ;;  %v3562_v57 = vld [vmem:[#allocation2 + $0xf0] sm:$0xff]  ;;  %v3564_v56 = vld [vmem:[#allocation2 + $0x100] sm:$0xff] }
  0xb0   :  { %v4781_v51 = vsel %vm4250_vm1, 4294967295, %v4780_v51  ;;  %2901 = vmatmul.msk.bf16.gmra.mxu1 %vm4250_vm1, %v3826_v22  ;;  %vm327_vm8 = vmor %vm4211_vm6, %vm291_vm7 }
  0xb1   :  { %vm4267_vm0 = vmpackc.low %vm4221_vm2, %vm327_vm8  ;;  %vm107_vm8 = vcmp.eq.s32.totalorder %v4274_v7, %v3867_v47  ;;  %1727 = vmatpush.bf16.msra.mxu3 %v3550_v53  ;;  %v3557_v53 = vld [vmem:[#allocation2 + $0xc8] sm:$0xff] }
  0xb2   :  { %v4783_v52 = vsel %vm4267_vm0, 4294967295, %v4782_v52  ;;  %2905 = vmatmul.msk.bf16.gmra.mxu2 %vm4267_vm0, %v3826_v22  ;;  %vm169_vm6 = vmor %vm85_vm10, %vm133_vm9  ;;  %vm68_vm9 = vcmp.eq.s32.totalorder %v4274_v7, %v3902_v0 }
  0xb3   :  { %vm244_vm2 = vmor %vm4229_vm5, %vm208_vm14  ;;  %vm116_vm5 = vcmp.eq.s32.totalorder %v4274_v7, %v3900_v63  ;;  %1705 = vmatpush.bf16.msra.mxu2 %v3545_v17  ;;  %1691 = vmatpush.bf16.msra.mxu1 %v3532_v62  ;;  %v3561_v17 = vld [vmem:[#allocation2 + $0xe8] sm:$0xff] }
  0xb4   :  { %vm253_vm4 = vmor %vm169_vm6, %vm217_vm15  ;;  %vm191_vm15 = vcmp.eq.s32.totalorder %v4274_v7, %v3861_v36 }
  0xb5   :  { %vm328_vm7 = vmor %vm244_vm2, %vm292_vm11  ;;  %vm275_vm2 = vcmp.eq.s32.totalorder %v4274_v7, %v4012_v16  ;;  %1728 = vmatpush.bf16.msra.mxu3 %v3549_v58  ;;  %v3681_v58 = vld [vmem:[#allocation2 + $0x4a8] sm:$0xff] }
  0xb6   :  { %vm337_vm10 = vmor %vm253_vm4, %vm301_vm12  ;;  %vm200_vm12 = vcmp.eq.s32.totalorder %v4274_v7, %v3863_v41 }
  0xb7   :  { %vm4293_vm14 = vmpackc.low %vm337_vm10, %vm328_vm7  ;;  %vm284_vm7 = vcmp.eq.s32.totalorder %v4274_v7, %v4010_v15  ;;  %1706 = vmatpush.bf16.msra.mxu2 %v3544_v27  ;;  %v3585_v27 = vld [vmem:[#allocation2 + $0x1a8] sm:$0xff] }
  0xb8   :  { %v4785_v12 = vsel %vm4293_vm14, 4294967295, %v4784_v12  ;;  %2909 = vmatmul.msk.bf16.gmra.mxu3 %vm4293_vm14, %v3826_v22  ;;  %vm143_vm6 = vmor %vm59_vm13, %vm107_vm8  ;;  %vm60_vm8 = vcmp.eq.s32.totalorder %v4306_v14, %v3869_v48 }
  0xb9   :  { %vm152_vm11 = vmor %vm68_vm9, %vm116_vm5  ;;  %vm108_vm9 = vcmp.eq.s32.totalorder %v4306_v14, %v3867_v47  ;;  %1729 = vmatpush.bf16.msra.mxu3 %v3548_v1  ;;  %v3597_v1 = vld [vmem:[#allocation2 + $0x208] sm:$0xff] }
  0xba   :  { %vm227_vm4 = vmor %vm143_vm6, %vm191_vm15  ;;  %vm69_vm15 = vcmp.eq.s32.totalorder %v4306_v14, %v3902_v0  ;;  %vm117_vm6 = vcmp.eq.s32.totalorder %v4306_v14, %v3900_v63 }
  0xbb   :  { %vm236_vm10 = vmor %vm152_vm11, %vm200_vm12  ;;  %vm192_vm11 = vcmp.eq.s32.totalorder %v4306_v14, %v3861_v36  ;;  %1707 = vmatpush.bf16.msra.mxu2 %v3543_v38  ;;  %v3568_v38 = vld [vmem:[#allocation2 + $0x120] sm:$0xff] }
  0xbc   :  { %vm311_vm13 = vmor %vm227_vm4, %vm275_vm2  ;;  %vm276_vm4 = vcmp.eq.s32.totalorder %v4306_v14, %v4012_v16 }
  0xbd   :  { %vm320_vm5 = vmor %vm236_vm10, %vm284_vm7  ;;  %vm201_vm7 = vcmp.eq.s32.totalorder %v4306_v14, %v3863_v41 }
  0xbe   :  { %vm4322_vm14 = vmpackc.low %vm320_vm5, %vm311_vm13  ;;  %vm285_vm13 = vcmp.eq.s32.totalorder %v4306_v14, %v4010_v15 }
  0xbf   :  { %v4787_v26 = vsel %vm4322_vm14, 4294967295, %v4786_v26  ;;  %2911 = vmatmul.msk.bf16.vlgmr.msrb.gmra.mxu0 %vm4322_vm14, %v3826_v22  ;;  %vm144_vm2 = vmor %vm60_vm8, %vm108_vm9  ;;  %vm61_vm9 = vcmp.eq.s32.totalorder %v4332_v30, %v3869_v48  ;;  %vm70_vm14 = vcmp.eq.s32.totalorder %v4332_v30, %v3902_v0  ;;  %1708 = vmatpush.bf16.msra.mxu2 %v3542_v44  ;;  %v3582_v44 = vld [vmem:[#allocation2 + $0x190] sm:$0xff] }
  0xc0   :  { %vm153_vm12 = vmor %vm69_vm15, %vm117_vm6  ;;  %vm109_vm15 = vcmp.eq.s32.totalorder %v4332_v30, %v3867_v47  ;;  %1741 = vmatpush.bf16.msrb.mxu0 %v3563_v4 }
  0xc1   :  { %vm228_vm10 = vmor %vm144_vm2, %vm192_vm11  ;;  %vm118_vm11 = vcmp.eq.s32.totalorder %v4332_v30, %v3900_v63 }
  0xc2   :  { %vm237_vm5 = vmor %vm153_vm12, %vm201_vm7  ;;  %vm193_vm12 = vcmp.eq.s32.totalorder %v4332_v30, %v3861_v36 }
  0xc3   :  { %vm312_vm8 = vmor %vm228_vm10, %vm276_vm4  ;;  %vm277_vm10 = vcmp.eq.s32.totalorder %v4332_v30, %v4012_v16  ;;  %1709 = vmatpush.bf16.msra.mxu2 %v3541_v55  ;;  %v3556_v55 = vld [vmem:[#allocation2 + $0xc0] sm:$0xff] }
  0xc4   :  { %vm321_vm6 = vmor %vm237_vm5, %vm285_vm13  ;;  %vm202_vm13 = vcmp.eq.s32.totalorder %v4332_v30, %v3863_v41  ;;  %1742 = vmatpush.bf16.msrb.mxu0 %v3562_v57  ;;  %v3670_v57 = vld [vmem:[#allocation2 + $0x450] sm:$0xff] }
  0xc5   :  { %vm4348_vm2 = vmpackc.low %vm321_vm6, %vm312_vm8  ;;  %vm286_vm8 = vcmp.eq.s32.totalorder %v4332_v30, %v4010_v15 }
  0xc6   :  { %v4789_v32 = vsel %vm4348_vm2, 4294967295, %v4788_v32  ;;  %2915 = vmatmul.msk.bf16.vlgmr.msrb.gmra.mxu1 %vm4348_vm2, %v3826_v22  ;;  %vm145_vm4 = vmor %vm61_vm9, %vm109_vm15  ;;  %vm62_vm2 = vcmp.eq.s32.totalorder %v4358_v34, %v3869_v48  ;;  %vm110_vm9 = vcmp.eq.s32.totalorder %v4358_v34, %v3867_v47 }
  0xc7   :  { %vm154_vm7 = vmor %vm70_vm14, %vm118_vm11  ;;  %vm71_vm14 = vcmp.eq.s32.totalorder %v4358_v34, %v3902_v0  ;;  %vm119_vm11 = vcmp.eq.s32.totalorder %v4358_v34, %v3900_v63  ;;  %1710 = vmatpush.bf16.msra.mxu2 %v3540_v61  ;;  %1760 = vmatpush.bf16.msrb.mxu1 %v3571_v8  ;;  %v3594_v61 = vld [vmem:[#allocation2 + $0x1f0] sm:$0xff]  ;;  %v3671_v8 = vld [vmem:[#allocation2 + $0x458] sm:$0xff] }
  0xc8   :  { %vm229_vm5 = vmor %vm145_vm4, %vm193_vm12  ;;  %vm194_vm12 = vcmp.eq.s32.totalorder %v4358_v34, %v3861_v36  ;;  %1743 = vmatpush.bf16.msrb.mxu0 %v3561_v17  ;;  %v3591_v17 = vld [vmem:[#allocation2 + $0x1d8] sm:$0xff] }
  0xc9   :  { %vm238_vm6 = vmor %vm154_vm7, %vm202_vm13  ;;  %vm203_vm13 = vcmp.eq.s32.totalorder %v4358_v34, %v3863_v41 }
  0xca   :  { %vm313_vm0 = vmor %vm229_vm5, %vm277_vm10  ;;  %vm278_vm10 = vcmp.eq.s32.totalorder %v4358_v34, %v4012_v16 }
  0xcb   :  { %vm322_vm15 = vmor %vm238_vm6, %vm286_vm8  ;;  %1761 = vmatpush.bf16.msrb.mxu1 %v3570_v11  ;;  %v3592_v11 = vld [vmem:[#allocation2 + $0x1e0] sm:$0xff] }
  0xcc   :  { %vm4374_vm1 = vmpackc.low %vm322_vm15, %vm313_vm0  ;;  %vm287_vm0 = vcmp.eq.s32.totalorder %v4358_v34, %v4010_v15  ;;  %vm77_vm15 = vcmp.eq.s32.totalorder %v4274_v7, %v3871_v50  ;;  %1744 = vmatpush.bf16.msrb.mxu0 %v3560_v31  ;;  %v3596_v31 = vld [vmem:[#allocation2 + $0x200] sm:$0xff] }
  0xcd   :  { %2919 = vmatmul.msk.bf16.vlgmr.msrb.gmra.mxu2 %vm4374_vm1, %v3826_v22  ;;  %vm146_vm4 = vmor %vm62_vm2, %vm110_vm9  ;;  %vm125_vm2 = vcmp.eq.s32.totalorder %v4274_v7, %v3951_v6 }
  0xce   :  { %vm155_vm7 = vmor %vm71_vm14, %vm119_vm11  ;;  %vm86_vm14 = vcmp.eq.s32.totalorder %v4274_v7, %v4076_v24  ;;  %vm134_vm11 = vcmp.eq.s32.totalorder %v4274_v7, %v4078_v25  ;;  %1779 = vmatpush.bf16.msrb.mxu2 %v3579_v3 }
  0xcf   :  { %vm230_vm5 = vmor %vm146_vm4, %vm194_vm12  ;;  %vm209_vm4 = vcmp.eq.s32.totalorder %v4274_v7, %v4131_v46  ;;  %1762 = vmatpush.bf16.msrb.mxu1 %v3569_v18  ;;  %v3677_v18 = vld [vmem:[#allocation2 + $0x488] sm:$0xff] }
  0xd0   :  { %vm239_vm8 = vmor %vm155_vm7, %vm203_vm13 }
  0xd1   :  { %vm314_vm6 = vmor %vm230_vm5, %vm278_vm10  ;;  %vm218_vm10 = vcmp.eq.s32.totalorder %v4274_v7, %v4048_v21  ;;  %vm293_vm5 = vcmp.eq.s32.totalorder %v4274_v7, %v4219_v2 }
  0xd2   :  { %vm323_vm9 = vmor %vm239_vm8, %vm287_vm0  ;;  %vm302_vm8 = vcmp.eq.s32.totalorder %v4274_v7, %v4111_v37  ;;  %v4796_v7 = vmov 0  ;;  %1780 = vmatpush.bf16.msrb.mxu2 %v3578_v10  ;;  %v3679_v10 = vld [vmem:[#allocation2 + $0x498] sm:$0xff] }
  0xd3   :  { %vm4397_vm12 = vmpackc.low %vm323_vm9, %vm314_vm6  ;;  %vm126_vm9 = vcmp.eq.s32.totalorder %v4306_v14, %v3951_v6  ;;  %1763 = vmatpush.bf16.msrb.mxu1 %v3568_v38 }
  0xd4   :  { %v4793_v49 = vsel %vm4397_vm12, 4294967295, %v4792_v49  ;;  %2923 = vmatmul.msk.bf16.vlgmr.msrb.gmra.mxu3 %vm4397_vm12, %v3826_v22  ;;  %vm161_vm7 = vmor %vm77_vm15, %vm125_vm2  ;;  %vm78_vm2 = vcmp.eq.s32.totalorder %v4306_v14, %v3871_v50 }
  0xd5   :  { %vm170_vm13 = vmor %vm86_vm14, %vm134_vm11  ;;  %vm87_vm11 = vcmp.eq.s32.totalorder %v4306_v14, %v4076_v24  ;;  %1798 = vmatpush.bf16.msrb.mxu3 %v3587_v9  ;;  %v3593_v9 = vld [vmem:[#allocation2 + $0x1e8] sm:$0xff] }
  0xd6   :  { %vm245_vm0 = vmor %vm161_vm7, %vm209_vm4  ;;  %vm135_vm4 = vcmp.eq.s32.totalorder %v4306_v14, %v4078_v25 }
  0xd7   :  { %vm254_vm6 = vmor %vm170_vm13, %vm218_vm10  ;;  %vm210_vm10 = vcmp.eq.s32.totalorder %v4306_v14, %v4131_v46 }
  0xd8   :  { %vm329_vm15 = vmor %vm245_vm0, %vm293_vm5  ;;  %vm219_vm5 = vcmp.eq.s32.totalorder %v4306_v14, %v4048_v21 }
  0xd9   :  { %vm338_vm14 = vmor %vm254_vm6, %vm302_vm8  ;;  %vm294_vm8 = vcmp.eq.s32.totalorder %v4306_v14, %v4219_v2  ;;  %1799 = vmatpush.bf16.msrb.mxu3 %v3586_v13  ;;  %v3678_v13 = vld [vmem:[#allocation2 + $0x490] sm:$0xff] }
  0xda   :  { %vm4429_vm7 = vmpackc.low %vm338_vm14, %vm329_vm15  ;;  %vm303_vm15 = vcmp.eq.s32.totalorder %v4306_v14, %v4111_v37  ;;  %v3577_v14 = vld [vmem:[#allocation2 + $0x168] sm:$0xff] }
  0xdb   :  { %2913 = vmatmul.msk.bf16.gmra.mxu0 %vm4429_vm7, %v3826_v22  ;;  %vm162_vm13 = vmor %vm78_vm2, %vm126_vm9  ;;  %vm79_vm2 = vcmp.eq.s32.totalorder %v4332_v30, %v3871_v50  ;;  %vm127_vm9 = vcmp.eq.s32.totalorder %v4332_v30, %v3951_v6  ;;  %1781 = vmatpush.bf16.msrb.mxu2 %v3577_v14  ;;  %v3669_v14 = vld [vmem:[#allocation2 + $0x448] sm:$0xff] }
  0xdc   :  { %vm171_vm0 = vmor %vm87_vm11, %vm135_vm4  ;;  %vm88_vm4 = vcmp.eq.s32.totalorder %v4332_v30, %v4076_v24 }
  0xdd   :  { %vm246_vm6 = vmor %vm162_vm13, %vm210_vm10  ;;  %vm136_vm10 = vcmp.eq.s32.totalorder %v4332_v30, %v4078_v25  ;;  %1800 = vmatpush.bf16.msrb.mxu3 %v3585_v27 }
  0xde   :  { %vm255_vm14 = vmor %vm171_vm0, %vm219_vm5  ;;  %vm211_vm5 = vcmp.eq.s32.totalorder %v4332_v30, %v4131_v46 }
  0xdf   :  { %vm330_vm12 = vmor %vm246_vm6, %vm294_vm8  ;;  %vm220_vm8 = vcmp.eq.s32.totalorder %v4332_v30, %v4048_v21 }
  0xe0   :  { %vm339_vm11 = vmor %vm255_vm14, %vm303_vm15  ;;  %vm304_vm14 = vcmp.eq.s32.totalorder %v4332_v30, %v4111_v37 }
  0xe1   :  { %vm4452_vm13 = vmpackc.low %vm339_vm11, %vm330_vm12  ;;  %vm295_vm12 = vcmp.eq.s32.totalorder %v4332_v30, %v4219_v2  ;;  %vm80_vm11 = vcmp.eq.s32.totalorder %v4358_v34, %v3871_v50  ;;  %v3576_v30 = vld [vmem:[#allocation2 + $0x160] sm:$0xff]  ;;  %1801 = vmatpush.bf16.msrb.mxu3 %v3584_v43 }
  0xe2   :  { %v4797_v7 = vsel %vm4452_vm13, 4294967295, %v4796_v7  ;;  %2917 = vmatmul.msk.bf16.gmra.mxu1 %vm4452_vm13, %v3826_v22  ;;  %vm163_vm0 = vmor %vm79_vm2, %vm127_vm9  ;;  %vm89_vm13 = vcmp.eq.s32.totalorder %v4358_v34, %v4076_v24  ;;  %1782 = vmatpush.bf16.msrb.mxu2 %v3576_v30  ;;  %v3590_v30 = vld [vmem:[#allocation2 + $0x1d0] sm:$0xff] }
  0xe3   :  { %vm172_vm6 = vmor %vm88_vm4, %vm136_vm10  ;;  %vm128_vm4 = vcmp.eq.s32.totalorder %v4358_v34, %v3951_v6 }
  0xe4   :  { %vm247_vm15 = vmor %vm163_vm0, %vm211_vm5  ;;  %vm137_vm5 = vcmp.eq.s32.totalorder %v4358_v34, %v4078_v25 }
  0xe5   :  { %vm256_vm2 = vmor %vm172_vm6, %vm220_vm8  ;;  %vm212_vm8 = vcmp.eq.s32.totalorder %v4358_v34, %v4131_v46 }
  0xe6   :  { %vm331_vm9 = vmor %vm247_vm15, %vm295_vm12  ;;  %vm221_vm12 = vcmp.eq.s32.totalorder %v4358_v34, %v4048_v21 }
  0xe7   :  { %vm340_vm10 = vmor %vm256_vm2, %vm304_vm14  ;;  %vm296_vm14 = vcmp.eq.s32.totalorder %v4358_v34, %v4219_v2 }
  0xe8   :  { %vm4475_vm0 = vmpackc.low %vm340_vm10, %vm331_vm9  ;;  %vm305_vm9 = vcmp.eq.s32.totalorder %v4358_v34, %v4111_v37  ;;  %vm63_vm10 = vcmp.eq.s32.totalorder %v4493_v29, %v3869_v48  ;;  %v3559_v48 = vld [vmem:[#allocation2 + $0xd8] sm:$0xff] }
  0xe9   :  { %v4799_v19 = vsel %vm4475_vm0, 4294967295, %v4798_v19  ;;  %2921 = vmatmul.msk.bf16.gmra.mxu2 %vm4475_vm0, %v3826_v22  ;;  %vm164_vm6 = vmor %vm80_vm11, %vm128_vm4  ;;  %1745 = vmatpush.bf16.msrb.mxu0 %v3559_v48  ;;  %v3667_v48 = vld [vmem:[#allocation2 + $0x438] sm:$0xff] }
  0xea   :  { %vm173_vm15 = vmor %vm89_vm13, %vm137_vm5  ;;  %vm111_vm13 = vcmp.eq.s32.totalorder %v4493_v29, %v3867_v47  ;;  %v3575_v47 = vld [vmem:[#allocation2 + $0x158] sm:$0xff] }
  0xeb   :  { %vm248_vm2 = vmor %vm164_vm6, %vm212_vm8  ;;  %vm72_vm8 = vcmp.eq.s32.totalorder %v4493_v29, %v3902_v0  ;;  %vm120_vm6 = vcmp.eq.s32.totalorder %v4493_v29, %v3900_v63  ;;  %v3567_v63 = vld [vmem:[#allocation2 + $0x118] sm:$0xff]  ;;  %1783 = vmatpush.bf16.msrb.mxu2 %v3575_v47  ;;  %v3676_v47 = vld [vmem:[#allocation2 + $0x480] sm:$0xff] }
  0xec   :  { %vm257_vm11 = vmor %vm173_vm15, %vm221_vm12  ;;  %vm195_vm12 = vcmp.eq.s32.totalorder %v4493_v29, %v3861_v36  ;;  %v3583_v0 = vld [vmem:[#allocation2 + $0x198] sm:$0xff]  ;;  %v3574_v36 = vld [vmem:[#allocation2 + $0x150] sm:$0xff]  ;;  %1764 = vmatpush.bf16.msrb.mxu1 %v3567_v63 }
  0xed   :  { %vm332_vm4 = vmor %vm248_vm2, %vm296_vm14  ;;  %vm279_vm2 = vcmp.eq.s32.totalorder %v4493_v29, %v4012_v16  ;;  %1802 = vmatpush.bf16.msrb.mxu3 %v3583_v0  ;;  %1746 = vmatpush.bf16.msrb.mxu0 %v3558_v39  ;;  %v3589_v63 = vld [vmem:[#allocation2 + $0x1c8] sm:$0xff]  ;;  %v3675_v0 = vld [vmem:[#allocation2 + $0x478] sm:$0xff] }
  0xee   :  { %vm341_vm5 = vmor %vm257_vm11, %vm305_vm9  ;;  %vm204_vm9 = vcmp.eq.s32.totalorder %v4493_v29, %v3863_v41  ;;  %v3827_v41 = vmov 0.0   ;;  %v3588_v39 = vld [vmem:[#allocation2 + $0x1c0] sm:$0xff] }
  0xef   :  { %vm4507_vm0 = vmpackc.low %vm341_vm5, %vm332_vm4  ;;  %vm288_vm4 = vcmp.eq.s32.totalorder %v4493_v29, %v4010_v15  ;;  %vm4802_vm5 = vnez %v4747_v20  ;;  %1784 = vmatpush.bf16.msrb.mxu2 %v3574_v36  ;;  %v3666_v36 = vld [vmem:[#allocation2 + $0x430] sm:$0xff] }
  0xf0   :  { %2925 = vmatmul.msk.bf16.gmra.mxu3 %vm4507_vm0, %v3826_v22  ;;  %vm147_vm15 = vmor %vm63_vm10, %vm111_vm13  ;;  %1765 = vmatpush.bf16.msrb.mxu1 %v3566_v40  ;;  %v3706_v20 = vld [vmem:[#allocation2 + $0x570] sm:$0xff] }
  0xf1   :  { %vm156_vm14 = vmor %vm72_vm8, %vm120_vm6  ;;  %vm81_vm6 = vcmp.eq.s32.totalorder %v4493_v29, %v3871_v50  ;;  %1803 = vmatpush.bf16.msrb.mxu3 %v3582_v44  ;;  %1747 = vmatpush.bf16.msrb.mxu0 %v3557_v53  ;;  %v3705_v44 = vld [vmem:[#allocation2 + $0x568] sm:$0xff] }
  0xf2   :  { %vm231_vm11 = vmor %vm147_vm15, %vm195_vm12  ;;  %3197 = vmatmul.msk.bf16.vlgmr.msra.gmra.mxu1 %vm4802_vm5, %v3826_v22  ;;  %vm129_vm12 = vcmp.eq.s32.totalorder %v4493_v29, %v3951_v6  ;;  %vm4719_vm15 = vcmask 392192   ;;  %v3581_v6 = vld [vmem:[#allocation2 + $0x188] sm:$0xff] }
  0xf3   :  { %vm240_vm10 = vmor %vm156_vm14, %vm204_vm9  ;;  %vm213_vm14 = vcmp.eq.s32.totalorder %v4493_v29, %v4131_v46  ;;  %1785 = vmatpush.bf16.msrb.mxu2 %v3573_v45  ;;  %v3595_v46 = vld [vmem:[#allocation2 + $0x1f8] sm:$0xff]  ;;  %v3689_v45 = vld [vmem:[#allocation2 + $0x4e8] sm:$0xff] }
  0xf4   :  { %vm315_vm13 = vmor %vm231_vm11, %vm279_vm2  ;;  %vm297_vm2 = vcmp.eq.s32.totalorder %v4493_v29, %v4219_v2  ;;  %vm4803_vm11 = vnez %v4750_v23  ;;  %v3572_v2 = vld [vmem:[#allocation2 + $0x140] sm:$0xff]  ;;  %1766 = vmatpush.bf16.msrb.mxu1 %v3565_v54  ;;  %v3697_v53 = vld [vmem:[#allocation2 + $0x528] sm:$0xff] }
  0xf5   :  { %vm324_vm8 = vmor %vm240_vm10, %vm288_vm4  ;;  %v2598_v42 = vsel %vm315_vm13, 1.0, %v3827_v41  ;;  %vm90_vm4 = vcmp.eq.s32.totalorder %v4493_v29, %v4076_v24  ;;  %vm138_vm10 = vcmp.eq.s32.totalorder %v4493_v29, %v4078_v25  ;;  %1804 = vmatpush.bf16.msrb.mxu3 %v3581_v6  ;;  %v3580_v24 = vld [vmem:[#allocation2 + $0x180] sm:$0xff]  ;;  %1748 = vmatpush.bf16.msrb.mxu0 %v3556_v55  ;;  %v3673_v25 = vld [vmem:[#allocation2 + $0x468] sm:$0xff] }
  0xf6   :  { %v2607_v15 = vsel %vm324_vm8, 1.0, %v3827_v41  ;;  %vm165_vm9 = vmor %vm81_vm6, %vm129_vm12  ;;  %vm222_vm12 = vcmp.eq.s32.totalorder %v4493_v29, %v4048_v21  ;;  %v3672_v21 = vld [vmem:[#allocation2 + $0x460] sm:$0xff]  ;;  %v3713_v50 = vld [vmem:[#allocation2 + $0x5a8] sm:$0xff] }
  0xf7   :  { %v4534_v16 = vpack.c.bf16 %v2607_v15, %v2598_v42  ;;  %vm249_vm13 = vmor %vm165_vm9, %vm213_vm14  ;;  %1786 = vmatpush.bf16.msrb.mxu2 %v3572_v2  ;;  %vm306_vm9 = vcmp.eq.s32.totalorder %v4493_v29, %v4111_v37  ;;  %v3680_v37 = vld [vmem:[#allocation2 + $0x4a0] sm:$0xff]  ;;  %v3674_v42 = vld [vmem:[#allocation2 + $0x470] sm:$0xff] }
  0xf8   :  { %vm4553_vm8 = vmor %vm249_vm13, %vm297_vm2  ;;  %1767 = vmatpush.bf16.msrb.mxu1 %v3564_v56  ;;  %vm4806_vm2 = vnez %v4753_v28  ;;  %vm4808_vm13 = vnez %v4783_v52  ;;  %v3668_v29 = vld [vmem:[#allocation2 + $0x440] sm:$0xff] }
  0xf9   :  { %2926 = vmatmul.msk.bf16.vlgmr.msra.gmra.mxu0 %vm4719_vm15, %v4534_v16  ;;  %3201 = vmatmul.msk.bf16.vlgmr.msra.gmra.mxu2 %vm4803_vm11, %v3826_v22  ;;  %vm174_vm6 = vmor %vm90_vm4, %vm138_vm10  ;;  %v2616_v62 = vsel %vm4553_vm8, 1.0, %v3827_v41  ;;  %vm4807_vm10 = vnez %v4781_v51  ;;  %vm4809_vm8 = vnez %v4787_v26  ;;  %v3704_v2 = vld [vmem:[#allocation2 + $0x560] sm:$0xff]  ;;  %v3715_v51 = vld [vmem:[#allocation2 + $0x5b8] sm:$0xff] }
  0xfa   :  { %vm258_vm14 = vmor %vm174_vm6, %vm222_vm12  ;;  %1805 = vmatpush.bf16.msrb.mxu3 %v3580_v24  ;;  %1817 = vmatpush.bf16.msra.mxu0 %v3595_v46  ;;  %vm4810_vm6 = vnez %v4755_v33  ;;  %vm4811_vm12 = vnez %v4789_v32  ;;  %v3688_v55 = vld [vmem:[#allocation2 + $0x4e0] sm:$0xff]  ;;  %v3703_v46 = vld [vmem:[#allocation2 + $0x558] sm:$0xff] }
  0xfb   :  { %vm342_vm4 = vmor %vm258_vm14, %vm306_vm9  ;;  %2392 = vmatpush.bf16.msra.mxu2 %v3673_v25  ;;  %v3696_v56 = vld [vmem:[#allocation2 + $0x520] sm:$0xff]  ;;  %vm4812_vm14 = vnez %v4785_v12  ;;  %vm4813_vm9 = vnez %v4797_v7 }
  0xfc   :  { %1841 = vmatpush.bf16.msra.mxu1 %v3598_v59  ;;  %v2625_v3 = vsel %vm342_vm4, 1.0, %v3827_v41  ;;  %v3712_v24 = vld [vmem:[#allocation2 + $0x5a0] sm:$0xff]  ;;  %v3695_v59 = vld [vmem:[#allocation2 + $0x518] sm:$0xff]  ;;  %vm4814_vm4 = vnez %v4799_v19 }
  0xfd   :  { %v4569_v4 = vpack.c.bf16 %v2625_v3, %v2616_v62 }
  0xfe   :  { %1818 = vmatpush.bf16.msra.mxu0 %v3594_v61  ;;  %v3702_v61 = vld [vmem:[#allocation2 + $0x550] sm:$0xff] }
  0xff   :  { %2393 = vmatpush.bf16.msra.mxu2 %v3672_v21  ;;  %v3711_v21 = vld [vmem:[#allocation2 + $0x598] sm:$0xff] }
 0x100   :  { %3205 = vmatmul.msk.bf16.vlgmr.msra.gmra.mxu3 %vm4806_vm2, %v3826_v22  ;;  %1842 = vmatpush.bf16.msra.mxu1 %v3597_v1  ;;  %v3694_v1 = vld [vmem:[#allocation2 + $0x510] sm:$0xff] }
 0x101   :  { %2411 = vmatpush.bf16.msra.mxu3 %v3681_v58  ;;  %v3687_v58 = vld [vmem:[#allocation2 + $0x4d8] sm:$0xff] }
 0x102   :  { %3199 = vmatmul.msk.bf16.gmra.mxu1 %vm4237_vm3, %v3826_v22  ;;  %1819 = vmatpush.bf16.msra.mxu0 %v3593_v9  ;;  %v3710_v9 = vld [vmem:[#allocation2 + $0x590] sm:$0xff] }
 0x103   :  { %2394 = vmatpush.bf16.msra.mxu2 %v3671_v8 }
 0x104   :  { %1843 = vmatpush.bf16.msra.mxu1 %v3596_v31 }
 0x105   :  { %2412 = vmatpush.bf16.msra.mxu3 %v3680_v37  ;;  %v3686_v37 = vld [vmem:[#allocation2 + $0x4d0] sm:$0xff] }
 0x106   :  { %1820 = vmatpush.bf16.msra.mxu0 %v3592_v11  ;;  %v3685_v11 = vld [vmem:[#allocation2 + $0x4c8] sm:$0xff] }
 0x107   :  { %2395 = vmatpush.bf16.msra.mxu2 %v3670_v57  ;;  %v3701_v57 = vld [vmem:[#allocation2 + $0x548] sm:$0xff] }
 0x109   :  { %2927 = vmatmul.msk.bf16.gmra.mxu0 %vm4719_vm15, %v4569_v4  ;;  %3203 = vmatmul.msk.bf16.gmra.mxu2 %vm4807_vm10, %v3826_v22 }
 0x10a   :  { %2413 = vmatpush.bf16.msra.mxu3 %v3679_v10  ;;  %1821 = vmatpush.bf16.msra.mxu0 %v3591_v17 }
 0x10b   :  { %2396 = vmatpush.bf16.msra.mxu2 %v3669_v14  ;;  %v3709_v14 = vld [vmem:[#allocation2 + $0x588] sm:$0xff] }
 0x10e   :  { %2414 = vmatpush.bf16.msra.mxu3 %v3678_v13  ;;  %1822 = vmatpush.bf16.msra.mxu0 %v3590_v30  ;;  %v3693_v13 = vld [vmem:[#allocation2 + $0x508] sm:$0xff]  ;;  %v3692_v30 = vld [vmem:[#allocation2 + $0x500] sm:$0xff] }
 0x10f   :  { %2397 = vmatpush.bf16.msra.mxu2 %v3668_v29  ;;  %v3684_v29 = vld [vmem:[#allocation2 + $0x4c0] sm:$0xff] }
 0x110   :  { %3207 = vmatmul.msk.bf16.gmra.mxu3 %vm4808_vm13, %v3826_v22  ;;  %v1120_v27 = vpop.f32.mrf.mxu0 }
 0x112   :  { %3213 = vmatmul.msk.bf16.vlgmr.msrb.gmra.mxu1 %vm4809_vm8, %v3826_v22  ;;  %2415 = vmatpush.bf16.msra.mxu3 %v3677_v18  ;;  %v3700_v18 = vld [vmem:[#allocation2 + $0x540] sm:$0xff] }
 0x113   :  { %v1139_v38 = vpop.f32.mrf.mxu1  ;;  %2398 = vmatpush.bf16.msra.mxu2 %v3667_v48  ;;  %1823 = vmatpush.bf16.msra.mxu0 %v3589_v63  ;;  %v3683_v48 = vld [vmem:[#allocation2 + $0x4b8] sm:$0xff] }
 0x114   :  { %v1140_v43 = vadd.f32 %v1139_v38, %v1120_v27  ;;  %2449 = vmatpush.bf16.msrb.mxu1 %v3697_v53  ;;  %v3691_v63 = vld [vmem:[#allocation2 + $0x4f8] sm:$0xff] }
 0x116   :  { %2416 = vmatpush.bf16.msra.mxu3 %v3676_v47  ;;  %v3699_v47 = vld [vmem:[#allocation2 + $0x538] sm:$0xff] }
 0x117   :  { %2399 = vmatpush.bf16.msra.mxu2 %v3666_v36  ;;  %1824 = vmatpush.bf16.msra.mxu0 %v3588_v39  ;;  %v3707_v36 = vld [vmem:[#allocation2 + $0x578] sm:$0xff] }
 0x118   :  { %v4596_v6 = vpop.f32.mrf.mxu0  ;;  %2450 = vmatpush.bf16.msrb.mxu1 %v3696_v56  ;;  %v3732_v56 = vld [vmem:[#allocation2 + $0x640] sm:$0xff] }
 0x119   :  { %3209 = vmatmul.msk.bf16.vlgmr.msrb.gmra.mxu0 %vm4810_vm6, %v3826_v22  ;;  %3217 = vmatmul.msk.bf16.vlgmr.msrb.gmra.mxu2 %vm4811_vm12, %v3826_v22 }
 0x11a   :  { %2417 = vmatpush.bf16.msra.mxu3 %v3675_v0 }
 0x11b   :  { %2468 = vmatpush.bf16.msrb.mxu2 %v3705_v44  ;;  %2430 = vmatpush.bf16.msrb.mxu0 %v3689_v45  ;;  %v4598_v25 = vpop.f32.mrf.mxu1  ;;  %v3690_v44 = vld [vmem:[#allocation2 + $0x4f0] sm:$0xff] }
 0x11c   :  { %v1158_v40 = vpop.f32.mrf.mxu2  ;;  %2451 = vmatpush.bf16.msrb.mxu1 %v3695_v59 }
 0x11d   :  { %v1159_v41 = vadd.f32 %v1158_v40, %v1140_v43  ;;  %v3708_v43 = vld [vmem:[#allocation2 + $0x580] sm:$0xff]  ;;  %v3698_v40 = vld [vmem:[#allocation2 + $0x530] sm:$0xff] }
 0x11e   :  { %2418 = vmatpush.bf16.msra.mxu3 %v3674_v42 }
 0x11f   :  { %v1177_v15 = vpop.f32.mrf.mxu3  ;;  %2469 = vmatpush.bf16.msrb.mxu2 %v3704_v2  ;;  %2431 = vmatpush.bf16.msrb.mxu0 %v3688_v55  ;;  %v1142_v2 = vadd.f32 %v4598_v25, %v4596_v6  ;;  %v3731_v6 = vld [vmem:[#allocation2 + $0x638] sm:$0xff] }
 0x120   :  { %3221 = vmatmul.msk.bf16.vlgmr.msrb.gmra.mxu3 %vm4374_vm1, %v3826_v22  ;;  %v4591_v54 = vadd.f32 %v1177_v15, %v1159_v41  ;;  %2452 = vmatpush.bf16.msrb.mxu1 %v3694_v1  ;;  %v3682_v41 = vld [vmem:[#allocation2 + $0x4b0] sm:$0xff]  ;;  %v3719_v1 = vld [vmem:[#allocation2 + $0x5d8] sm:$0xff] }
 0x122   :  { %3215 = vmatmul.msk.bf16.gmra.mxu1 %vm4429_vm7, %v3826_v22  ;;  %2487 = vmatpush.bf16.msrb.mxu3 %v3713_v50 }
 0x123   :  { %2470 = vmatpush.bf16.msrb.mxu2 %v3703_v46  ;;  %2432 = vmatpush.bf16.msrb.mxu0 %v3687_v58  ;;  %v3729_v46 = vld [vmem:[#allocation2 + $0x628] sm:$0xff] }
 0x124   :  { %v1160_v3 = vpop.f32.mrf.mxu2  ;;  %2453 = vmatpush.bf16.msrb.mxu1 %v3693_v13 }
 0x125   :  { %v1161_v58 = vadd.f32 %v1160_v3, %v1142_v2 }
 0x126   :  { %2488 = vmatpush.bf16.msrb.mxu3 %v3712_v24  ;;  %v3721_v24 = vld [vmem:[#allocation2 + $0x5e8] sm:$0xff] }
 0x127   :  { %2471 = vmatpush.bf16.msrb.mxu2 %v3702_v61  ;;  %2433 = vmatpush.bf16.msrb.mxu0 %v3686_v37  ;;  %v1179_v17 = vpop.f32.mrf.mxu3  ;;  %v3728_v61 = vld [vmem:[#allocation2 + $0x620] sm:$0xff] }
 0x128   :  { %2454 = vmatpush.bf16.msrb.mxu1 %v3692_v30  ;;  %v1180_v37 = vadd.f32 %v1179_v17, %v1161_v58  ;;  %v3725_v17 = vld [vmem:[#allocation2 + $0x608] sm:$0xff] }
 0x129   :  { %3211 = vmatmul.msk.bf16.gmra.mxu0 %vm4812_vm14, %v3826_v22  ;;  %3219 = vmatmul.msk.bf16.gmra.mxu2 %vm4813_vm9, %v3826_v22 }
 0x12a   :  { %2489 = vmatpush.bf16.msrb.mxu3 %v3711_v21  ;;  %v3720_v21 = vld [vmem:[#allocation2 + $0x5e0] sm:$0xff] }
 0x12b   :  { %v1125_v62 = vpop.f32.mrf.mxu0  ;;  %2472 = vmatpush.bf16.msrb.mxu2 %v3701_v57  ;;  %2434 = vmatpush.bf16.msrb.mxu0 %v3685_v11  ;;  %v3726_v11 = vld [vmem:[#allocation2 + $0x610] sm:$0xff] }
 0x12c   :  { %2455 = vmatpush.bf16.msrb.mxu1 %v3691_v63  ;;  %v3714_v63 = vld [vmem:[#allocation2 + $0x5b0] sm:$0xff] }
 0x12d   :  { %v1144_v8 = vpop.f32.mrf.mxu1 }
 0x12e   :  { %v1145_v10 = vadd.f32 %v1144_v8, %v1125_v62  ;;  %2490 = vmatpush.bf16.msrb.mxu3 %v3710_v9  ;;  %v3727_v8 = vld [vmem:[#allocation2 + $0x618] sm:$0xff] }
 0x12f   :  { %2473 = vmatpush.bf16.msrb.mxu2 %v3700_v18  ;;  %2435 = vmatpush.bf16.msrb.mxu0 %v3684_v29  ;;  %v3730_v29 = vld [vmem:[#allocation2 + $0x630] sm:$0xff] }
 0x130   :  { %3223 = vmatmul.msk.bf16.gmra.mxu3 %vm4814_vm4, %v3826_v22  ;;  %2456 = vmatpush.bf16.msrb.mxu1 %v3690_v44 }
 0x132   :  { %3228 = vmatmul.msk.bf16.vlgmr.msra.gmra.mxu1 %vm4719_vm15, %v4534_v16  ;;  %2491 = vmatpush.bf16.msrb.mxu3 %v3709_v14  ;;  %vm4815_vm15 = vnez %v4793_v49  ;;  %v3717_v14 = vld [vmem:[#allocation2 + $0x5c8] sm:$0xff] }
 0x133   :  { %v1127_v27 = vpop.f32.mrf.mxu0  ;;  %2474 = vmatpush.bf16.msrb.mxu2 %v3699_v47  ;;  %2436 = vmatpush.bf16.msrb.mxu0 %v3683_v48  ;;  %v3723_v47 = vld [vmem:[#allocation2 + $0x5f8] sm:$0xff] }
 0x134   :  { %2525 = vmatpush.bf16.msra.mxu1 %v3729_v46 }
 0x135   :  { %v1163_v31 = vpop.f32.mrf.mxu2  ;;  %v1146_v0 = vpop.f32.mrf.mxu1 }
 0x136   :  { %v1164_v38 = vadd.f32 %v1163_v31, %v1145_v10  ;;  %2492 = vmatpush.bf16.msrb.mxu3 %v3708_v43  ;;  %v1147_v50 = vadd.f32 %v1146_v0, %v1127_v27  ;;  %v3718_v10 = vld [vmem:[#allocation2 + $0x5d0] sm:$0xff]  ;;  %v3724_v27 = vld [vmem:[#allocation2 + $0x600] sm:$0xff] }
 0x137   :  { %2475 = vmatpush.bf16.msrb.mxu2 %v3698_v40  ;;  %2437 = vmatpush.bf16.msrb.mxu0 %v3682_v41  ;;  %v3722_v0 = vld [vmem:[#allocation2 + $0x5f0] sm:$0xff] }
 0x138   :  { %2526 = vmatpush.bf16.msra.mxu1 %v3728_v61 }
 0x139   :  { %3225 = vmatmul.msk.bf16.vlgmr.msra.gmra.mxu0 %vm4815_vm15, %v3826_v22  ;;  %3499 = vmatmul.msk.bf16.vlgmr.msra.gmra.mxu2 %vm4802_vm5, %v3826_v22  ;;  %vm4816_vm5 = vcmask 392192  }
 0x13a   :  { %2493 = vmatpush.bf16.msrb.mxu3 %v3707_v36 }
 0x13b   :  { %v1182_v39 = vpop.f32.mrf.mxu3  ;;  %2549 = vmatpush.bf16.msra.mxu2 %v3732_v56  ;;  %2506 = vmatpush.bf16.msra.mxu0 %v3721_v24 }
 0x13c   :  { %v4617_v42 = vadd.f32 %v1182_v39, %v1164_v38  ;;  %v1196_v15 = vpop.f32.mrf.mxu0  ;;  %2527 = vmatpush.bf16.msra.mxu1 %v3727_v8 }
 0x13d   :  { %v1165_v45 = vpop.f32.mrf.mxu2  ;;  %v1197_v53 = vadd.f32 %v1196_v15, %v4591_v54 }
 0x13e   :  { %v1166_v55 = vadd.f32 %v1165_v45, %v1147_v50  ;;  %2494 = vmatpush.bf16.msrb.mxu3 %v3706_v20 }
 0x13f   :  { %2507 = vmatpush.bf16.msra.mxu0 %v3720_v21  ;;  %2550 = vmatpush.bf16.msra.mxu2 %v3731_v6 }
 0x140   :  { %3503 = vmatmul.msk.bf16.vlgmr.msra.gmra.mxu3 %vm4803_vm11, %v3826_v22  ;;  %2528 = vmatpush.bf16.msra.mxu1 %v3726_v11 }
 0x142   :  { %3229 = vmatmul.msk.bf16.gmra.mxu1 %vm4816_vm5, %v4569_v4  ;;  %3733 = vmatpush.bf16.msra.mxu3 %v3721_v24 }
 0x143   :  { %v1184_v54 = vpop.f32.mrf.mxu3  ;;  %v1215_v59 = vpop.f32.mrf.mxu1  ;;  %2508 = vmatpush.bf16.msra.mxu0 %v3719_v1  ;;  %2551 = vmatpush.bf16.msra.mxu2 %v3730_v29 }
 0x144   :  { %v4627_v25 = vadd.f32 %v1184_v54, %v1166_v55  ;;  %v1216_v23 = vadd.f32 %v1215_v59, %v1197_v53  ;;  %v1198_v62 = vpop.f32.mrf.mxu0  ;;  %2529 = vmatpush.bf16.msra.mxu1 %v3725_v17 }
 0x145   :  { %v1199_v3 = vadd.f32 %v1198_v62, %v1180_v37 }
 0x146   :  { %3734 = vmatpush.bf16.msra.mxu3 %v3720_v21 }
 0x147   :  { %2509 = vmatpush.bf16.msra.mxu0 %v3718_v10 }
 0x148   :  { %2530 = vmatpush.bf16.msra.mxu1 %v3724_v27 }
 0x149   :  { %3227 = vmatmul.msk.bf16.gmra.mxu0 %vm4507_vm0, %v3826_v22  ;;  %3501 = vmatmul.msk.bf16.gmra.mxu2 %vm4237_vm3, %v3826_v22  ;;  %vm4817_vm3 = vmmov %vm4816_vm5 }
 0x14a   :  { %3735 = vmatpush.bf16.msra.mxu3 %v3719_v1 }
 0x14b   :  { %v1217_v9 = vpop.f32.mrf.mxu1  ;;  %2510 = vmatpush.bf16.msra.mxu0 %v3717_v14 }
 0x14c   :  { %v1218_v57 = vadd.f32 %v1217_v9, %v1199_v3  ;;  %2531 = vmatpush.bf16.msra.mxu1 %v3723_v47 }
 0x14e   :  { %3736 = vmatpush.bf16.msra.mxu3 %v3718_v10 }
 0x14f   :  { %2511 = vmatpush.bf16.msra.mxu0 %v3716_v5 }
 0x150   :  { %3505 = vmatmul.msk.bf16.gmra.mxu3 %vm4807_vm10, %v3826_v22  ;;  %v1234_v13 = vpop.f32.mrf.mxu2  ;;  %2532 = vmatpush.bf16.msra.mxu1 %v3722_v0 }
 0x151   :  { %v1235_v18 = vadd.f32 %v1234_v13, %v1216_v23 }
 0x152   :  { %3511 = vmatmul.msk.bf16.vlgmr.msrb.gmra.mxu1 %vm4810_vm6, %v3826_v22  ;;  %3737 = vmatpush.bf16.msra.mxu3 %v3717_v14 }
 0x153   :  { %2512 = vmatpush.bf16.msra.mxu0 %v3715_v51 }
 0x156   :  { %3738 = vmatpush.bf16.msra.mxu3 %v3716_v5 }
 0x157   :  { %v1253_v30 = vpop.f32.mrf.mxu3  ;;  %2513 = vmatpush.bf16.msra.mxu0 %v3714_v63 }
 0x158   :  { %v1254_v31 = vadd.f32 %v1253_v30, %v1235_v18  ;;  %v1236_v38 = vpop.f32.mrf.mxu2  ;;  %v1201_v43 = vpop.f32.mrf.mxu0 }
 0x159   :  { %3507 = vmatmul.msk.bf16.vlgmr.msrb.gmra.mxu0 %vm4806_vm2, %v3826_v22  ;;  %3515 = vmatmul.msk.bf16.vlgmr.msrb.gmra.mxu2 %vm4809_vm8, %v3826_v22  ;;  %v1237_v33 = vadd.f32 %v1236_v38, %v1218_v57  ;;  %v1202_v48 = vadd.f32 %v1201_v43, %v4617_v42 }
 0x15a   :  { %3739 = vmatpush.bf16.msra.mxu3 %v3715_v51 }
 0x15e   :  { %3740 = vmatpush.bf16.msra.mxu3 %v3714_v63 }
 0x15f   :  { %v1255_v36 = vpop.f32.mrf.mxu3  ;;  %v1220_v39 = vpop.f32.mrf.mxu1 }
 0x160   :  { %3519 = vmatmul.msk.bf16.vlgmr.msrb.gmra.mxu3 %vm4811_vm12, %v3826_v22  ;;  %v1256_v28 = vadd.f32 %v1255_v36, %v1237_v33  ;;  %v1221_v40 = vadd.f32 %v1220_v39, %v1202_v48  ;;  %v1203_v26 = vpop.f32.mrf.mxu0 }
 0x161   :  { %v1204_v41 = vadd.f32 %v1203_v26, %v4627_v25 }
 0x162   :  { %3513 = vmatmul.msk.bf16.gmra.mxu1 %vm4812_vm14, %v3826_v22 }
 0x167   :  { %v1222_v42 = vpop.f32.mrf.mxu1 }
 0x168   :  { %v1223_v15 = vadd.f32 %v1222_v42, %v1204_v41 }
 0x169   :  { %3509 = vmatmul.msk.bf16.gmra.mxu0 %vm4808_vm13, %v3826_v22  ;;  %3517 = vmatmul.msk.bf16.gmra.mxu2 %vm4429_vm7, %v3826_v22 }
 0x16c   :  { %v1239_v32 = vpop.f32.mrf.mxu2 }
 0x16d   :  { %v1240_v44 = vadd.f32 %v1239_v32, %v1221_v40 }
 0x16f   :  { %v1693_v45 = vpop.f32.mrf.mxu1 }
 0x170   :  { %3521 = vmatmul.msk.bf16.gmra.mxu3 %vm4813_vm9, %v3826_v22 }
 0x172   :  { %3527 = vmatmul.msk.bf16.vlgmr.msra.gmra.mxu1 %vm4815_vm15, %v3826_v22 }
 0x173   :  { %v1258_v12 = vpop.f32.mrf.mxu3 }
 0x174   :  { %v1259_v53 = vadd.f32 %v1258_v12, %v1240_v44  ;;  %v1241_v50 = vpop.f32.mrf.mxu2 }
 0x175   :  { %v1242_v52 = vadd.f32 %v1241_v50, %v1223_v15 }
 0x176   :  { %v1272_v20 = vpop.f32.mrf.mxu0 }
 0x177   :  { %v1273_v2 = vadd.f32 %v1272_v20, %v1254_v31  ;;  %v1695_v55 = vpop.f32.mrf.mxu1 }
 0x179   :  { %v1694_v60 = vadd.f32 %v1693_v45, %v1273_v2  ;;  %3523 = vmatmul.msk.bf16.vlgmr.msra.gmra.mxu0 %vm4374_vm1, %v3826_v22  ;;  %3530 = vmatmul.msk.bf16.vlgmr.msra.gmra.mxu2 %vm4817_vm3, %v4534_v16  ;;  %vm4818_vm1 = vmmov %vm4817_vm3 }
 0x17b   :  { %v1260_v7 = vpop.f32.mrf.mxu3 }
 0x17c   :  { %v1261_v56 = vadd.f32 %v1260_v7, %v1242_v52  ;;  %v1712_v24 = vpop.f32.mrf.mxu2 }
 0x17d   :  { %v1713_v49 = vadd.f32 %v1712_v24, %v1694_v60 }
 0x17e   :  { %v1274_v46 = vpop.f32.mrf.mxu0 }
 0x17f   :  { %v1275_v58 = vadd.f32 %v1274_v46, %v1256_v28  ;;  %v1698_v54 = vpop.f32.mrf.mxu1 }
 0x180   :  { %3525 = vmatmul.msk.bf16.vlgmr.msra.gmra.mxu3 %vm4814_vm4, %v3826_v22 }
 0x181   :  { %v1696_v59 = vadd.f32 %v1695_v55, %v1275_v58 }
 0x182   :  { %3529 = vmatmul.msk.bf16.gmra.mxu1 %vm4507_vm0, %v3826_v22 }
 0x183   :  { %v1731_v35 = vpop.f32.mrf.mxu3 }
 0x184   :  { %v1732_v21 = vadd.f32 %v1731_v35, %v1713_v49  ;;  %v1714_v6 = vpop.f32.mrf.mxu2 }
 0x185   :  { %v1715_v16 = vadd.f32 %v1714_v6, %v1696_v59 }
 0x186   :  { %v1277_v25 = vpop.f32.mrf.mxu0 }
 0x187   :  { %v1278_v23 = vadd.f32 %v1277_v25, %v1259_v53  ;;  %v1700_v61 = vpop.f32.mrf.mxu1 }
 0x189   :  { %v1699_v62 = vadd.f32 %v1698_v54, %v1278_v23  ;;  %3531 = vmatmul.msk.bf16.gmra.mxu2 %vm4818_vm1, %v4569_v4 }
 0x18b   :  { %v1733_v37 = vpop.f32.mrf.mxu3 }
 0x18c   :  { %v1734_v1 = vadd.f32 %v1733_v37, %v1715_v16  ;;  %v1717_v19 = vpop.f32.mrf.mxu2 }
 0x18d   :  { %v1718_v3 = vadd.f32 %v1717_v19, %v1699_v62 }
 0x18e   :  { %v1279_v8 = vpop.f32.mrf.mxu0 }
 0x18f   :  { %v1280_v9 = vadd.f32 %v1279_v8, %v1261_v56  ;;  %v1769_v10 = vpop.f32.mrf.mxu1 }
 0x191   :  { %v1701_v34 = vadd.f32 %v1700_v61, %v1280_v9 }
 0x193   :  { %v1736_v22 = vpop.f32.mrf.mxu3 }
 0x194   :  { %v1737_v57 = vadd.f32 %v1736_v22, %v1718_v3  ;;  %v1719_v11 = vpop.f32.mrf.mxu2 }
 0x195   :  { %v1720_v13 = vadd.f32 %v1719_v11, %v1701_v34 }
 0x196   :  { %v1750_v14 = vpop.f32.mrf.mxu0 }
 0x197   :  { %v1751_v17 = vadd.f32 %v1750_v14, %v1732_v21  ;;  %v1771_v18 = vpop.f32.mrf.mxu1 }
 0x199   :  { %v1770_v5 = vadd.f32 %v1769_v10, %v1751_v17 }
 0x19b   :  { %v1738_v27 = vpop.f32.mrf.mxu3 }
 0x19c   :  { %v1739_v29 = vadd.f32 %v1738_v27, %v1720_v13  ;;  %v1788_v30 = vpop.f32.mrf.mxu2 }
 0x19d   :  { %v1789_v4 = vadd.f32 %v1788_v30, %v1770_v5 }
 0x19e   :  { %v1752_v51 = vpop.f32.mrf.mxu0 }
 0x19f   :  { %v1753_v31 = vadd.f32 %v1752_v51, %v1734_v1  ;;  %v1774_v38 = vpop.f32.mrf.mxu1 }
 0x1a1   :  { %v1772_v43 = vadd.f32 %v1771_v18, %v1753_v31 }
 0x1a3   :  { %v1807_v47 = vpop.f32.mrf.mxu3 }
 0x1a4   :  { %v1808_v33 = vadd.f32 %v1807_v47, %v1789_v4  ;;  %v1790_v48 = vpop.f32.mrf.mxu2 }
 0x1a5   :  { %v1791_v63 = vadd.f32 %v1790_v48, %v1772_v43 }
 0x1a6   :  { %v1755_v0 = vpop.f32.mrf.mxu0 }
 0x1a7   :  { %v1756_v36 = vadd.f32 %v1755_v0, %v1737_v57  ;;  %v1776_v39 = vpop.f32.mrf.mxu1 }
 0x1a9   :  { %v1775_v28 = vadd.f32 %v1774_v38, %v1756_v36 }
 0x1ab   :  { %v1809_v40 = vpop.f32.mrf.mxu3 }
 0x1ac   :  { %v1810_v26 = vadd.f32 %v1809_v40, %v1791_v63  ;;  %v1793_v41 = vpop.f32.mrf.mxu2 }
 0x1ad   :  { %v1794_v42 = vadd.f32 %v1793_v41, %v1775_v28 }
 0x1ae   :  { %v1757_v15 = vpop.f32.mrf.mxu0 }
 0x1af   :  { %v1758_v32 = vadd.f32 %v1757_v15, %v1739_v29  ;;  %v1845_v44 = vpop.f32.mrf.mxu1 }
 0x1b1   :  { %v1777_v45 = vadd.f32 %v1776_v39, %v1758_v32 }
 0x1b3   :  { %v1812_v12 = vpop.f32.mrf.mxu3 }
 0x1b4   :  { %v1813_v53 = vadd.f32 %v1812_v12, %v1794_v42  ;;  %v1795_v50 = vpop.f32.mrf.mxu2 }
 0x1b5   :  { %v1796_v52 = vadd.f32 %v1795_v50, %v1777_v45 }
 0x1b6   :  { %v1826_v20 = vpop.f32.mrf.mxu0 }
 0x1b7   :  { %v1827_v2 = vadd.f32 %v1826_v20, %v1808_v33  ;;  %v1847_v55 = vpop.f32.mrf.mxu1 }
 0x1b9   :  { %v1846_v60 = vadd.f32 %v1845_v44, %v1827_v2 }
 0x1bb   :  { %v1814_v7 = vpop.f32.mrf.mxu3 }
 0x1bc   :  { %v1815_v56 = vadd.f32 %v1814_v7, %v1796_v52  ;;  %v2401_v24 = vpop.f32.mrf.mxu2 }
 0x1be   :  { %v1828_v49 = vpop.f32.mrf.mxu0 }
 0x1bf   :  { %v1829_v46 = vadd.f32 %v1828_v49, %v1810_v26  ;;  %v1850_v58 = vpop.f32.mrf.mxu1 }
 0x1c1   :  { %v4680_v54 = vadd.f32 %v1847_v55, %v1829_v46 }
 0x1c3   :  { %v2420_v59 = vpop.f32.mrf.mxu3 }
 0x1c4   :  { %v2403_v35 = vpop.f32.mrf.mxu2  ;;  %v2421_v5 = vadd.f32 %v2420_v59, %v2401_v24 }
 0x1c6   :  { %v1831_v21 = vpop.f32.mrf.mxu0 }
 0x1c7   :  { %v1832_v6 = vadd.f32 %v1831_v21, %v1813_v53  ;;  %v1852_v16 = vpop.f32.mrf.mxu1 }
 0x1c9   :  { %v4682_v25 = vadd.f32 %v1850_v58, %v1832_v6 }
 0x1cb   :  { %v2422_v23 = vpop.f32.mrf.mxu3 }
 0x1cc   :  { %v2406_v61 = vpop.f32.mrf.mxu2  ;;  %v2423_v31 = vadd.f32 %v2422_v23, %v2403_v35 }
 0x1ce   :  { %v1833_v62 = vpop.f32.mrf.mxu0 }
 0x1cf   :  { %v1834_v37 = vadd.f32 %v1833_v62, %v1815_v56  ;;  %v2458_v1 = vpop.f32.mrf.mxu1 }
 0x1d1   :  { %v4684_v19 = vadd.f32 %v1852_v16, %v1834_v37 }
 0x1d3   :  { %v2425_v3 = vpop.f32.mrf.mxu3 }
 0x1d4   :  { %v2408_v8 = vpop.f32.mrf.mxu2  ;;  %v2426_v40 = vadd.f32 %v2425_v3, %v2406_v61 }
 0x1d6   :  { %v2439_v9 = vpop.f32.mrf.mxu0 }
 0x1d7   :  { %v2460_v10 = vpop.f32.mrf.mxu1  ;;  %v2440_v27 = vadd.f32 %v2439_v9, %v2421_v5 }
 0x1d9   :  { %v2459_v51 = vadd.f32 %v2458_v1, %v2440_v27 }
 0x1db   :  { %v2427_v34 = vpop.f32.mrf.mxu3 }
 0x1dc   :  { %v2477_v22 = vpop.f32.mrf.mxu2  ;;  %v2428_v20 = vadd.f32 %v2427_v34, %v2408_v8 }
 0x1dd   :  { %v2478_v38 = vadd.f32 %v2477_v22, %v2459_v51 }
 0x1de   :  { %v2441_v57 = vpop.f32.mrf.mxu0 }
 0x1df   :  { %v2463_v11 = vpop.f32.mrf.mxu1  ;;  %v2442_v47 = vadd.f32 %v2441_v57, %v2423_v31 }
 0x1e1   :  { %v2461_v36 = vadd.f32 %v2460_v10, %v2442_v47 }
 0x1e3   :  { %v2496_v13 = vpop.f32.mrf.mxu3 }
 0x1e4   :  { %v2479_v14 = vpop.f32.mrf.mxu2  ;;  %v2497_v63 = vadd.f32 %v2496_v13, %v2478_v38 }
 0x1e5   :  { %v2480_v28 = vadd.f32 %v2479_v14, %v2461_v36 }
 0x1e6   :  { %v2444_v17 = vpop.f32.mrf.mxu0 }
 0x1e7   :  { %v2465_v18 = vpop.f32.mrf.mxu1  ;;  %v2445_v44 = vadd.f32 %v2444_v17, %v2426_v40 }
 0x1e9   :  { %v2464_v52 = vadd.f32 %v2463_v11, %v2445_v44 }
 0x1eb   :  { %v2498_v29 = vpop.f32.mrf.mxu3 }
 0x1ec   :  { %v2482_v30 = vpop.f32.mrf.mxu2  ;;  %v2499_v32 = vadd.f32 %v2498_v29, %v2480_v28 }
 0x1ed   :  { %v2483_v2 = vadd.f32 %v2482_v30, %v2464_v52 }
 0x1ee   :  { %v2446_v4 = vpop.f32.mrf.mxu0 }
 0x1ef   :  { %v2534_v43 = vpop.f32.mrf.mxu1  ;;  %v2447_v24 = vadd.f32 %v2446_v4, %v2428_v20 }
 0x1f1   :  { %v2466_v35 = vadd.f32 %v2465_v18, %v2447_v24 }
 0x1f3   :  { %v2501_v33 = vpop.f32.mrf.mxu3 }
 0x1f4   :  { %v2484_v48 = vpop.f32.mrf.mxu2  ;;  %v2502_v58 = vadd.f32 %v2501_v33, %v2483_v2 }
 0x1f5   :  { %v2485_v6 = vadd.f32 %v2484_v48, %v2466_v35 }
 0x1f6   :  { %v2515_v0 = vpop.f32.mrf.mxu0 }
 0x1f7   :  { %v2516_v39 = vadd.f32 %v2515_v0, %v2497_v63  ;;  %v2536_v15 = vpop.f32.mrf.mxu1 }
 0x1f9   :  { %v2535_v41 = vadd.f32 %v2534_v43, %v2516_v39 }
 0x1fb   :  { %v2503_v26 = vpop.f32.mrf.mxu3 }
 0x1fc   :  { %v2553_v42 = vpop.f32.mrf.mxu2  ;;  %v2504_v62 = vadd.f32 %v2503_v26, %v2485_v6 }
 0x1fd   :  { %v2554_v45 = vadd.f32 %v2553_v42, %v2535_v41 }
 0x1fe   :  { %v2517_v12 = vpop.f32.mrf.mxu0 }
 0x1ff   :  { %v2563_v53 = vadd.f32 %v2554_v45, %v1846_v60  ;;  %v2518_v50 = vadd.f32 %v2517_v12, %v2499_v32  ;;  %v2539_v46 = vpop.f32.mrf.mxu1 }
 0x201   :  { %2567 = vst [vmem:[#allocation5] sm:$0xff] %v2563_v53  ;;  %v2537_v55 = vadd.f32 %v2536_v15, %v2518_v50 }
 0x203   :  { %v2520_v7 = vpop.f32.mrf.mxu3 }
 0x204   :  { %v2555_v56 = vpop.f32.mrf.mxu2  ;;  %v2521_v21 = vadd.f32 %v2520_v7, %v2502_v58 }
 0x205   :  { %v2556_v49 = vadd.f32 %v2555_v56, %v2537_v55 }
 0x206   :  { %v2540_v16 = vadd.f32 %v2539_v46, %v2521_v21 }
 0x207   :  { %v2564_v59 = vadd.f32 %v2556_v49, %v4680_v54  ;;  %v2541_v1 = vpop.f32.mrf.mxu1 }
 0x209   :  { %2568 = vst [vmem:[#allocation5 + $0x8] sm:$0xff] %v2564_v59 }
 0x20b   :  { %v2522_v61 = vpop.f32.mrf.mxu3 }
 0x20c   :  { %v2558_v60 = vpop.f32.mrf.mxu2  ;;  %v2523_v3 = vadd.f32 %v2522_v61, %v2504_v62 }
 0x20d   :  { %v2559_v23 = vadd.f32 %v2558_v60, %v2540_v16 }
 0x20e   :  { %v2542_v8 = vadd.f32 %v2541_v1, %v2523_v3 }
 0x20f   :  { %v2565_v37 = vadd.f32 %v2559_v23, %v4682_v25 }
 0x211   :  { %2569 = vst [vmem:[#allocation5 + $0x10] sm:$0xff] %v2565_v37 }
 0x214   :  { %v2560_v54 = vpop.f32.mrf.mxu2 }
 0x215   :  { %v2561_v9 = vadd.f32 %v2560_v54, %v2542_v8 }
 0x217   :  { %v2566_v10 = vadd.f32 %v2561_v9, %v4684_v19 }
 0x219   :  { %2570 = vst [vmem:[#allocation5 + $0x18] sm:$0xff] %v2566_v10 }
 0x21a   :  { %2583 = dma.vmem_to_hbm [thread:$0]  %s2576_s23, 512, %s2578_s26, [#allocation4], %s3829_s27, %s3829_s27, %s3830_s28  }
 0x21b   :  { %3817 = dma.done.wait [#allocation4], 512  }
 0x21c   :  { %3818 = vsyncadd [#allocation4], 4294966784 }
 0x21d   :  { %2588 = vsyncpa [#allocation3], 1 }
 0x21e   :  { %2589 = vsyncpa [#allocation4], 1 }

</bundles_post_ra>
